<compile_context>
chip_gen: v7x
topology: tpu7x:2x2x1
jax: 0.10.0
libtpu: 0.0.40
codegen_flags: <defaults>
</compile_context>

<pallas_src>
import numpy as np
import jax
import jax.numpy as jnp
from jax.experimental import pallas as pl
from jax.experimental.pallas import tpu as pltpu

PYRAMIDS = [0.5, 0.75]
SUBLANE = 8                      # f32 sublane granule (class-dim padding)


def _round_up(x, m):
    return (x + m - 1) // m * m


def _vmem_limit_bytes():
    """Per-generation scoped-VMEM budget (v5e/v6e: 128 MiB phys; v7x: 64 MiB)."""
    try:
        kind = jax.devices()[0].device_kind.lower()
    except Exception:
        kind = ""
    if "v5" in kind or "v6" in kind:
        return 96 * 1024 * 1024
    return 48 * 1024 * 1024


def _pick_last_tile(m, cap):
    """Tile for a flattened H*W lane axis: full if small, else a /128 divisor."""
    if m <= cap:
        return m
    t = (cap // 128) * 128
    while t >= 128:
        if m % t == 0:
            return t
        t -= 128
    return m


def _pick_plane_tile(p, cap=64):
    """Largest divisor of p <= cap that still leaves >= 2 grid steps (if p>=2)."""
    limit = min(cap, p)
    if p >= 2:
        limit = min(limit, max(1, p // 2))
    for t in range(limit, 0, -1):
        if p % t == 0:
            return t
    return 1


# --------------------------- 1x1 conv ("scale") -----------------------------
# out[n] = w^T @ x[n] + b  with x[n]: (C, H*W)  ->  lane axis = H*W (dense).

def _conv1x1_kernel(w_ref, b_ref, x_ref, o_ref):
    # w: (Kpad, C) resident, b: (Kpad, 1) resident, x: (C, T)  ->  o: (Kpad, T)
    o_ref[...] = (
        jnp.dot(w_ref[...], x_ref[...], preferred_element_type=jnp.float32)
        + b_ref[...]
    )


def pallas_conv1x1(x_ncm, wT_pad, b_pad, *, t_hw_cap=4096):
    """(N, C, M) -> (N, Kpad, M).  Grid over (batch, HW tiles); no transposes."""
    n, c, m = x_ncm.shape
    kpad = wT_pad.shape[0]
    t_hw = _pick_last_tile(m, t_hw_cap)
    # TODO(synk): for large C_in add a reduction grid axis over C ("arbitrary",
    # last) with a VMEM f32 accumulator; unnecessary at C_in=4.
    return pl.pallas_call(
        _conv1x1_kernel,
        out_shape=jax.ShapeDtypeStruct((n, kpad, m), jnp.float32),
        grid=(n, m // t_hw),
        in_specs=[
            pl.BlockSpec((kpad, c), lambda i, j: (0, 0)),       # VMEM-resident
            pl.BlockSpec((kpad, 1), lambda i, j: (0, 0)),       # VMEM-resident
            pl.BlockSpec((None, c, t_hw), lambda i, j: (i, 0, j)),
        ],
        out_specs=pl.BlockSpec((None, kpad, t_hw), lambda i, j: (i, 0, j)),
        compiler_params=pltpu.CompilerParams(
            dimension_semantics=("parallel", "parallel"),
            vmem_limit_bytes=_vmem_limit_bytes()),
    )(wT_pad, b_pad, x_ncm)


# ------------------- batched separable bilinear resize ----------------------

def _resize_block_kernel(ah_ref, awt_ref, x_ref, o_ref):
    # x: (TP, H, W), ah: (OH, H), awt: (W, OW)  ->  o: (TP, OH, OW)
    tp = x_ref.shape[0]
    awt = jnp.broadcast_to(awt_ref[...], (tp,) + awt_ref.shape)
    ah = jnp.broadcast_to(ah_ref[...], (tp,) + ah_ref.shape)
    xw = jnp.einsum('phw,pwv->phv', x_ref[...], awt,
                    preferred_element_type=jnp.float32)          # W pass
    o_ref[...] = jnp.einsum('poh,phv->pov', ah, xw,
                            preferred_element_type=jnp.float32)  # H pass


def pallas_resize_planes(x_planes, ah, awt, *, tp_cap=64):
    """x_planes: (P, H, W) -> (P, OH, OW);  ah: (OH, H), awt: (W, OW)."""
    p, h, w = x_planes.shape
    oh, ow = ah.shape[0], awt.shape[1]
    tp = _pick_plane_tile(p, tp_cap)
    return pl.pallas_call(
        _resize_block_kernel,
        out_shape=jax.ShapeDtypeStruct((p, oh, ow), jnp.float32),
        grid=(p // tp,),
        in_specs=[
            pl.BlockSpec((oh, h), lambda i: (0, 0)),             # resident
            pl.BlockSpec((w, ow), lambda i: (0, 0)),             # resident
            pl.BlockSpec((tp, h, w), lambda i: (i, 0, 0)),
        ],
        out_specs=pl.BlockSpec((tp, oh, ow), lambda i: (i, 0, 0)),
        compiler_params=pltpu.CompilerParams(
            dimension_semantics=("parallel",),
            vmem_limit_bytes=_vmem_limit_bytes()),
    )(ah, awt, x_planes)


# ------------- batched pyramid upsample + running elementwise max -----------

def _upsample_max_kernel(ah_ref, awt_ref, lp_ref, run_ref, o_ref):
    tp = lp_ref.shape[0]
    awt = jnp.broadcast_to(awt_ref[...], (tp,) + awt_ref.shape)
    ah = jnp.broadcast_to(ah_ref[...], (tp,) + ah_ref.shape)
    xw = jnp.einsum('phw,pwv->phv', lp_ref[...], awt,
                    preferred_element_type=jnp.float32)
    up = jnp.einsum('poh,phv->pov', ah, xw,
                    preferred_element_type=jnp.float32)
    o_ref[...] = jnp.maximum(up, run_ref[...])


def pallas_upsample_max(lp_planes, run_planes, ah, awt, *, tp_cap=64):
    """run <- max(bilinear_upsample(lp), run), updated in place via aliasing."""
    p, sh, sw = lp_planes.shape
    oh, ow = ah.shape[0], awt.shape[1]
    assert run_planes.shape == (p, oh, ow)
    tp = _pick_plane_tile(p, tp_cap)
    return pl.pallas_call(
        _upsample_max_kernel,
        out_shape=jax.ShapeDtypeStruct((p, oh, ow), jnp.float32),
        grid=(p // tp,),
        in_specs=[
            pl.BlockSpec((oh, sh), lambda i: (0, 0)),            # resident
            pl.BlockSpec((sw, ow), lambda i: (0, 0)),            # resident
            pl.BlockSpec((tp, sh, sw), lambda i: (i, 0, 0)),
            pl.BlockSpec((tp, oh, ow), lambda i: (i, 0, 0)),     # same map as out
        ],
        out_specs=pl.BlockSpec((tp, oh, ow), lambda i: (i, 0, 0)),
        input_output_aliases={3: 0},          # running-max buffer reused
        compiler_params=pltpu.CompilerParams(
            dimension_semantics=("parallel",),
            vmem_limit_bytes=_vmem_limit_bytes()),
    )(ah, awt, lp_planes, run_planes)


# ------------------------------- glue (JAX) ---------------------------------

def _interp_matrix(in_size, out_size):
    """Row matrix reproducing PyTorch bilinear (align_corners=False): out = A @ in."""
    scale = in_size / out_size
    dst = np.arange(out_size, dtype=np.float64)
    src = (dst + 0.5) * scale - 0.5
    src = np.maximum(src, 0.0)                     # PyTorch clamps negatives
    i0 = np.minimum(np.floor(src).astype(np.int64), in_size - 1)
    i1 = np.minimum(i0 + 1, in_size - 1)
    frac = src - np.floor(src)
    A = np.zeros((out_size, in_size), dtype=np.float32)
    A[np.arange(out_size), i0] += (1.0 - frac).astype(np.float32)
    A[np.arange(out_size), i1] += frac.astype(np.float32)
    return jnp.asarray(A)


def msc_forward(x, w, b, pyramids=PYRAMIDS):
    """Eval-mode MSC.forward: elementwise max over full-scale + pyramid logits.

    x: (N, C, H, W);  w: (C, K) 1x1-conv weight;  b: (K,) bias.
    """
    n, c, H, W = x.shape
    k = w.shape[1]
    kpad = _round_up(k, SUBLANE)                       # 6 -> 8, not 128
    wT_pad = jnp.pad(jnp.transpose(w), ((0, kpad - k), (0, 0)))   # (Kpad, C)
    b_pad = jnp.pad(b, (0, kpad - k)).reshape(kpad, 1)            # (Kpad, 1)

    def conv_head(x_ncm):                              # (N, C, M) -> (N, Kpad, M)
        return pallas_conv1x1(x_ncm, wT_pad, b_pad)

    # Full-scale logits become the running-max buffer, already in plane layout.
    run = conv_head(x.reshape(n, c, H * W)).reshape(n * kpad, H, W)
    x_planes = x.reshape(n * c, H, W)

    for p in pyramids:
        sh, sw = int(H * p), int(W * p)
        ah_dn = _interp_matrix(H, sh)
        aw_dn = _interp_matrix(W, sw)
        xp = pallas_resize_planes(x_planes, ah_dn, aw_dn.T)       # (N*C, sh, sw)
        lp = conv_head(xp.reshape(n, c, sh * sw))                 # (N, Kpad, sh*sw)
        ah_up = _interp_matrix(sh, H)
        aw_up = _interp_matrix(sw, W)
        run = pallas_upsample_max(lp.reshape(n * kpad, sh, sw), run,
                                  ah_up, aw_up.T)

    # TODO(synk): training-mode branch (return plain full-scale logits) not exercised.
    # TODO(synk): optional linear-head fold (resize∘conv∘resize == combined
    #             resample of the logits) not applied, to keep the generic
    #             MSC structure; valid only while the head stays linear.
    return run.reshape(n, kpad, H, W)[:, :k]


# ------------------------------ reference -----------------------------------

def msc_reference(x, w, b, pyramids=PYRAMIDS):
    def conv(xx):
        return jnp.einsum('nchw,ck->nkhw', xx, w) + b[None, :, None, None]

    def resize(xx, oh, ow):
        h, wd = xx.shape[2:]
        Ah = _interp_matrix(h, oh)
        Aw = _interp_matrix(wd, ow)
        return jnp.einsum('oh,pw,nchw->ncop', Ah, Aw, xx)

    H, W = x.shape[2:]
    outs = [conv(x)]
    for p in pyramids:
        sh, sw = int(H * p), int(W * p)
        outs.append(resize(conv(resize(x, sh, sw)), H, W))
    return jnp.max(jnp.stack(outs), axis=0)


# --------------------------------- main --------------------------------------

if __name__ == "__main__":
    key = jax.random.PRNGKey(0)
    kx, kw, kb = jax.random.split(key, 3)

    N, C_IN, H, W = 2, 4, 16, 16
    NUM_CLASSES = 6

    x = jax.random.normal(kx, (N, C_IN, H, W), dtype=jnp.float32)
    w = jax.random.normal(kw, (C_IN, NUM_CLASSES), dtype=jnp.float32) * 0.1
    b = jax.random.normal(kb, (NUM_CLASSES,), dtype=jnp.float32) * 0.1

    fwd = jax.jit(msc_forward)
    out = jax.block_until_ready(fwd(x, w, b))
    ref = jax.block_until_ready(msc_reference(x, w, b))

    assert out.shape == (N, NUM_CLASSES, H, W), out.shape
    assert np.allclose(np.asarray(out), np.asarray(ref), atol=1e-4, rtol=1e-4)

    print("KERNEL_OK")
</pallas_src>

<mosaic_0001>
module attributes {stable_mosaic.version = 11 : i64} {
  func.func @_conv1x1_kernel(%arg0: i32, %arg1: i32, %arg2: memref<8x4xf32, #tpu.memory_space<vmem>>, %arg3: memref<8x1xf32, #tpu.memory_space<vmem>>, %arg4: memref<1x4x64xf32, #tpu.memory_space<vmem>>, %arg5: memref<1x8x64xf32, #tpu.memory_space<vmem>>) attributes {dimension_semantics = [#tpu.dimension_semantics<parallel>, #tpu.dimension_semantics<parallel>], iteration_bounds = array<i64: 2, 1>, scalar_prefetch = 0 : i64, scratch_operands = 0 : i64, tpu.core_type = #tpu.core_type<tc>, window_params = [{pipeline_mode = #tpu.pipeline_mode<synchronous>, transform_indices = @transform_0, window_bounds = array<i64: 8, 4>}, {pipeline_mode = #tpu.pipeline_mode<synchronous>, transform_indices = @transform_1, window_bounds = array<i64: 8, 1>}, {transform_indices = @transform_2, window_bounds = array<i64: 1, 4, 64>}, {transform_indices = @transform_3, window_bounds = array<i64: 1, 8, 64>}]} {
    %c0 = arith.constant 0 : index
    %c0_0 = arith.constant 0 : index
    %0 = vector.load %arg2[%c0, %c0_0] : memref<8x4xf32, #tpu.memory_space<vmem>>, vector<8x4xf32>
    %c0_1 = arith.constant 0 : index
    %c0_2 = arith.constant 0 : index
    %c0_3 = arith.constant 0 : index
    %1 = vector.load %arg4[%c0_1, %c0_2, %c0_3] : memref<1x4x64xf32, #tpu.memory_space<vmem>>, vector<1x4x64xf32>
    %2 = vector.shape_cast %1 : vector<1x4x64xf32> to vector<4x64xf32>
    %cst = arith.constant dense<0.000000e+00> : vector<8x64xf32>
    %3 = tpu.matmul %0, %2, %cst {dimension_numbers = #tpu.dot_dimension_numbers<[1], [0], [0], [1], [0, 0, 1, 1], [], []>} : vector<8x4xf32>, vector<4x64xf32>, vector<8x64xf32> -> vector<8x64xf32>
    %c0_4 = arith.constant 0 : index
    %c0_5 = arith.constant 0 : index
    %4 = vector.load %arg3[%c0_4, %c0_5] : memref<8x1xf32, #tpu.memory_space<vmem>>, vector<8x1xf32>
    %5 = vector.broadcast %4 : vector<8x1xf32> to vector<8x64xf32>
    %6 = arith.addf %3, %5 : vector<8x64xf32>
    %c0_6 = arith.constant 0 : index
    %c0_7 = arith.constant 0 : index
    %c0_8 = arith.constant 0 : index
    %7 = vector.load %arg5[%c0_6, %c0_7, %c0_8] : memref<1x8x64xf32, #tpu.memory_space<vmem>>, vector<1x8x64xf32>
    %8 = vector.shape_cast %7 : vector<1x8x64xf32> to vector<8x64xf32>
    %9 = vector.shape_cast %6 : vector<8x64xf32> to vector<1x8x64xf32>
    tpu.vector_store %arg5[%c0_6, %c0_7, %c0_8], %9 {strides = array<i32>} : memref<1x8x64xf32, #tpu.memory_space<vmem>>, vector<1x8x64xf32>,
    return
  }
  func.func @transform_0(%arg0: i32, %arg1: i32) -> (i32, i32) {
    %c0_i32 = arith.constant 0 : i32
    %c0_i32_0 = arith.constant 0 : i32
    %c0_i32_1 = arith.constant 0 : i32
    return %c0_i32, %c0_i32_0 : i32, i32
  }
  func.func @transform_1(%arg0: i32, %arg1: i32) -> (i32, i32) {
    %c0_i32 = arith.constant 0 : i32
    %c0_i32_0 = arith.constant 0 : i32
    %c0_i32_1 = arith.constant 0 : i32
    return %c0_i32, %c0_i32_0 : i32, i32
  }
  func.func @transform_2(%arg0: i32, %arg1: i32) -> (i32, i32, i32) {
    %c0_i32 = arith.constant 0 : i32
    %c0_i32_0 = arith.constant 0 : i32
    return %arg0, %c0_i32, %arg1 : i32, i32, i32
  }
  func.func @transform_3(%arg0: i32, %arg1: i32) -> (i32, i32, i32) {
    %c0_i32 = arith.constant 0 : i32
    %c0_i32_0 = arith.constant 0 : i32
    return %arg0, %c0_i32, %arg1 : i32, i32, i32
  }
}

module attributes {stable_mosaic.version = 11 : i64} {
  func.func @_resize_block_kernel(%arg0: i32, %arg1: memref<8x16xf32, #tpu.memory_space<vmem>>, %arg2: memref<16x8xf32, #tpu.memory_space<vmem>>, %arg3: memref<4x16x16xf32, #tpu.memory_space<vmem>>, %arg4: memref<4x8x8xf32, #tpu.memory_space<vmem>>) attributes {dimension_semantics = [#tpu.dimension_semantics<parallel>], iteration_bounds = array<i64: 2>, scalar_prefetch = 0 : i64, scratch_operands = 0 : i64, tpu.core_type = #tpu.core_type<tc>, window_params = [{pipeline_mode = #tpu.pipeline_mode<synchronous>, transform_indices = @transform_0, window_bounds = array<i64: 8, 16>}, {pipeline_mode = #tpu.pipeline_mode<synchronous>, transform_indices = @transform_1, window_bounds = array<i64: 16, 8>}, {transform_indices = @transform_2, window_bounds = array<i64: 4, 16, 16>}, {transform_indices = @transform_3, window_bounds = array<i64: 4, 8, 8>}]} {
    %c0 = arith.constant 0 : index
    %c0_0 = arith.constant 0 : index
    %0 = vector.load %arg2[%c0, %c0_0] : memref<16x8xf32, #tpu.memory_space<vmem>>, vector<16x8xf32>
    %1 = vector.shape_cast %0 : vector<16x8xf32> to vector<1x16x8xf32>
    %2 = vector.broadcast %1 : vector<1x16x8xf32> to vector<4x16x8xf32>
    %c0_1 = arith.constant 0 : index
    %c0_2 = arith.constant 0 : index
    %3 = vector.load %arg1[%c0_1, %c0_2] : memref<8x16xf32, #tpu.memory_space<vmem>>, vector<8x16xf32>
    %4 = vector.shape_cast %3 : vector<8x16xf32> to vector<1x8x16xf32>
    %5 = vector.broadcast %4 : vector<1x8x16xf32> to vector<4x8x16xf32>
    %c0_3 = arith.constant 0 : index
    %c0_4 = arith.constant 0 : index
    %c0_5 = arith.constant 0 : index
    %6 = vector.load %arg3[%c0_3, %c0_4, %c0_5] : memref<4x16x16xf32, #tpu.memory_space<vmem>>, vector<4x16x16xf32>
    "tpu.trace_start"() <{level = 10 : i32, message = "phw,pwv->phv"}> : () -> ()
    %cst = arith.constant dense<0.000000e+00> : vector<4x16x8xf32>
    %7 = tpu.matmul %6, %2, %cst {dimension_numbers = #tpu.dot_dimension_numbers<[2], [1], [1], [2], [0, 0, 0, 1, 1, 2], [0], [0]>} : vector<4x16x16xf32>, vector<4x16x8xf32>, vector<4x16x8xf32> -> vector<4x16x8xf32>
    "tpu.trace_stop"() : () -> ()
    "tpu.trace_start"() <{level = 10 : i32, message = "poh,phv->pov"}> : () -> ()
    %cst_6 = arith.constant dense<0.000000e+00> : vector<4x8x8xf32>
    %8 = tpu.matmul %5, %7, %cst_6 {dimension_numbers = #tpu.dot_dimension_numbers<[2], [1], [1], [2], [0, 0, 0, 1, 1, 2], [0], [0]>} : vector<4x8x16xf32>, vector<4x16x8xf32>, vector<4x8x8xf32> -> vector<4x8x8xf32>
    "tpu.trace_stop"() : () -> ()
    %c0_7 = arith.constant 0 : index
    %c0_8 = arith.constant 0 : index
    %c0_9 = arith.constant 0 : index
    %9 = vector.load %arg4[%c0_7, %c0_8, %c0_9] : memref<4x8x8xf32, #tpu.memory_space<vmem>>, vector<4x8x8xf32>
    tpu.vector_store %arg4[%c0_7, %c0_8, %c0_9], %8 {strides = array<i32>} : memref<4x8x8xf32, #tpu.memory_space<vmem>>, vector<4x8x8xf32>,
    return
  }
  func.func @transform_0(%arg0: i32) -> (i32, i32) {
    %c0_i32 = arith.constant 0 : i32
    %c0_i32_0 = arith.constant 0 : i32
    %c0_i32_1 = arith.constant 0 : i32
    return %c0_i32, %c0_i32_0 : i32, i32
  }
  func.func @transform_1(%arg0: i32) -> (i32, i32) {
    %c0_i32 = arith.constant 0 : i32
    %c0_i32_0 = arith.constant 0 : i32
    %c0_i32_1 = arith.constant 0 : i32
    return %c0_i32, %c0_i32_0 : i32, i32
  }
  func.func @transform_2(%arg0: i32) -> (i32, i32, i32) {
    %c0_i32 = arith.constant 0 : i32
    %c0_i32_0 = arith.constant 0 : i32
    %c0_i32_1 = arith.constant 0 : i32
    return %arg0, %c0_i32, %c0_i32_0 : i32, i32, i32
  }
  func.func @transform_3(%arg0: i32) -> (i32, i32, i32) {
    %c0_i32 = arith.constant 0 : i32
    %c0_i32_0 = arith.constant 0 : i32
    %c0_i32_1 = arith.constant 0 : i32
    return %arg0, %c0_i32, %c0_i32_0 : i32, i32, i32
  }
}

module attributes {stable_mosaic.version = 11 : i64} {
  func.func @_upsample_max_kernel(%arg0: i32, %arg1: memref<16x8xf32, #tpu.memory_space<vmem>>, %arg2: memref<8x16xf32, #tpu.memory_space<vmem>>, %arg3: memref<8x8x8xf32, #tpu.memory_space<vmem>>, %arg4: memref<8x16x16xf32, #tpu.memory_space<vmem>>, %arg5: memref<8x16x16xf32, #tpu.memory_space<vmem>>) attributes {dimension_semantics = [#tpu.dimension_semantics<parallel>], iteration_bounds = array<i64: 2>, scalar_prefetch = 0 : i64, scratch_operands = 0 : i64, tpu.core_type = #tpu.core_type<tc>, window_params = [{pipeline_mode = #tpu.pipeline_mode<synchronous>, transform_indices = @transform_0, window_bounds = array<i64: 16, 8>}, {pipeline_mode = #tpu.pipeline_mode<synchronous>, transform_indices = @transform_1, window_bounds = array<i64: 8, 16>}, {transform_indices = @transform_2, window_bounds = array<i64: 8, 8, 8>}, {transform_indices = @transform_3, window_bounds = array<i64: 8, 16, 16>}, {transform_indices = @transform_4, window_bounds = array<i64: 8, 16, 16>}]} {
    %c0 = arith.constant 0 : index
    %c0_0 = arith.constant 0 : index
    %0 = vector.load %arg2[%c0, %c0_0] : memref<8x16xf32, #tpu.memory_space<vmem>>, vector<8x16xf32>
    %1 = vector.shape_cast %0 : vector<8x16xf32> to vector<1x8x16xf32>
    %2 = vector.broadcast %1 : vector<1x8x16xf32> to vector<8x8x16xf32>
    %c0_1 = arith.constant 0 : index
    %c0_2 = arith.constant 0 : index
    %3 = vector.load %arg1[%c0_1, %c0_2] : memref<16x8xf32, #tpu.memory_space<vmem>>, vector<16x8xf32>
    %4 = vector.shape_cast %3 : vector<16x8xf32> to vector<1x16x8xf32>
    %5 = vector.broadcast %4 : vector<1x16x8xf32> to vector<8x16x8xf32>
    %c0_3 = arith.constant 0 : index
    %c0_4 = arith.constant 0 : index
    %c0_5 = arith.constant 0 : index
    %6 = vector.load %arg3[%c0_3, %c0_4, %c0_5] : memref<8x8x8xf32, #tpu.memory_space<vmem>>, vector<8x8x8xf32>
    "tpu.trace_start"() <{level = 10 : i32, message = "phw,pwv->phv"}> : () -> ()
    %cst = arith.constant dense<0.000000e+00> : vector<8x8x16xf32>
    %7 = tpu.matmul %6, %2, %cst {dimension_numbers = #tpu.dot_dimension_numbers<[2], [1], [1], [2], [0, 0, 0, 1, 1, 2], [0], [0]>} : vector<8x8x8xf32>, vector<8x8x16xf32>, vector<8x8x16xf32> -> vector<8x8x16xf32>
    "tpu.trace_stop"() : () -> ()
    "tpu.trace_start"() <{level = 10 : i32, message = "poh,phv->pov"}> : () -> ()
    %cst_6 = arith.constant dense<0.000000e+00> : vector<8x16x16xf32>
    %8 = tpu.matmul %5, %7, %cst_6 {dimension_numbers = #tpu.dot_dimension_numbers<[2], [1], [1], [2], [0, 0, 0, 1, 1, 2], [0], [0]>} : vector<8x16x8xf32>, vector<8x8x16xf32>, vector<8x16x16xf32> -> vector<8x16x16xf32>
    "tpu.trace_stop"() : () -> ()
    %c0_7 = arith.constant 0 : index
    %c0_8 = arith.constant 0 : index
    %c0_9 = arith.constant 0 : index
    %9 = vector.load %arg4[%c0_7, %c0_8, %c0_9] : memref<8x16x16xf32, #tpu.memory_space<vmem>>, vector<8x16x16xf32>
    %10 = arith.maximumf %8, %9 : vector<8x16x16xf32>
    %c0_10 = arith.constant 0 : index
    %c0_11 = arith.constant 0 : index
    %c0_12 = arith.constant 0 : index
    %11 = vector.load %arg5[%c0_10, %c0_11, %c0_12] : memref<8x16x16xf32, #tpu.memory_space<vmem>>, vector<8x16x16xf32>
    tpu.vector_store %arg5[%c0_10, %c0_11, %c0_12], %10 {strides = array<i32>} : memref<8x16x16xf32, #tpu.memory_space<vmem>>, vector<8x16x16xf32>,
    return
  }
  func.func @transform_0(%arg0: i32) -> (i32, i32) {
    %c0_i32 = arith.constant 0 : i32
    %c0_i32_0 = arith.constant 0 : i32
    %c0_i32_1 = arith.constant 0 : i32
    return %c0_i32, %c0_i32_0 : i32, i32
  }
  func.func @transform_1(%arg0: i32) -> (i32, i32) {
    %c0_i32 = arith.constant 0 : i32
    %c0_i32_0 = arith.constant 0 : i32
    %c0_i32_1 = arith.constant 0 : i32
    return %c0_i32, %c0_i32_0 : i32, i32
  }
  func.func @transform_2(%arg0: i32) -> (i32, i32, i32) {
    %c0_i32 = arith.constant 0 : i32
    %c0_i32_0 = arith.constant 0 : i32
    %c0_i32_1 = arith.constant 0 : i32
    return %arg0, %c0_i32, %c0_i32_0 : i32, i32, i32
  }
  func.func @transform_3(%arg0: i32) -> (i32, i32, i32) {
    %c0_i32 = arith.constant 0 : i32
    %c0_i32_0 = arith.constant 0 : i32
    %c0_i32_1 = arith.constant 0 : i32
    return %arg0, %c0_i32, %c0_i32_0 : i32, i32, i32
  }
  func.func @transform_4(%arg0: i32) -> (i32, i32, i32) {
    %c0_i32 = arith.constant 0 : i32
    %c0_i32_0 = arith.constant 0 : i32
    %c0_i32_1 = arith.constant 0 : i32
    return %arg0, %c0_i32, %c0_i32_0 : i32, i32, i32
  }
}

module attributes {stable_mosaic.version = 11 : i64} {
  func.func @_conv1x1_kernel(%arg0: i32, %arg1: i32, %arg2: memref<8x4xf32, #tpu.memory_space<vmem>>, %arg3: memref<8x1xf32, #tpu.memory_space<vmem>>, %arg4: memref<1x4x256xf32, #tpu.memory_space<vmem>>, %arg5: memref<1x8x256xf32, #tpu.memory_space<vmem>>) attributes {dimension_semantics = [#tpu.dimension_semantics<parallel>, #tpu.dimension_semantics<parallel>], iteration_bounds = array<i64: 2, 1>, scalar_prefetch = 0 : i64, scratch_operands = 0 : i64, tpu.core_type = #tpu.core_type<tc>, window_params = [{pipeline_mode = #tpu.pipeline_mode<synchronous>, transform_indices = @transform_0, window_bounds = array<i64: 8, 4>}, {pipeline_mode = #tpu.pipeline_mode<synchronous>, transform_indices = @transform_1, window_bounds = array<i64: 8, 1>}, {transform_indices = @transform_2, window_bounds = array<i64: 1, 4, 256>}, {transform_indices = @transform_3, window_bounds = array<i64: 1, 8, 256>}]} {
    %c0 = arith.constant 0 : index
    %c0_0 = arith.constant 0 : index
    %0 = vector.load %arg2[%c0, %c0_0] : memref<8x4xf32, #tpu.memory_space<vmem>>, vector<8x4xf32>
    %c0_1 = arith.constant 0 : index
    %c0_2 = arith.constant 0 : index
    %c0_3 = arith.constant 0 : index
    %1 = vector.load %arg4[%c0_1, %c0_2, %c0_3] : memref<1x4x256xf32, #tpu.memory_space<vmem>>, vector<1x4x256xf32>
    %2 = vector.shape_cast %1 : vector<1x4x256xf32> to vector<4x256xf32>
    %cst = arith.constant dense<0.000000e+00> : vector<8x256xf32>
    %3 = tpu.matmul %0, %2, %cst {dimension_numbers = #tpu.dot_dimension_numbers<[1], [0], [0], [1], [0, 0, 1, 1], [], []>} : vector<8x4xf32>, vector<4x256xf32>, vector<8x256xf32> -> vector<8x256xf32>
    %c0_4 = arith.constant 0 : index
    %c0_5 = arith.constant 0 : index
    %4 = vector.load %arg3[%c0_4, %c0_5] : memref<8x1xf32, #tpu.memory_space<vmem>>, vector<8x1xf32>
    %5 = vector.broadcast %4 : vector<8x1xf32> to vector<8x256xf32>
    %6 = arith.addf %3, %5 : vector<8x256xf32>
    %c0_6 = arith.constant 0 : index
    %c0_7 = arith.constant 0 : index
    %c0_8 = arith.constant 0 : index
    %7 = vector.load %arg5[%c0_6, %c0_7, %c0_8] : memref<1x8x256xf32, #tpu.memory_space<vmem>>, vector<1x8x256xf32>
    %8 = vector.shape_cast %7 : vector<1x8x256xf32> to vector<8x256xf32>
    %9 = vector.shape_cast %6 : vector<8x256xf32> to vector<1x8x256xf32>
    tpu.vector_store %arg5[%c0_6, %c0_7, %c0_8], %9 {strides = array<i32>} : memref<1x8x256xf32, #tpu.memory_space<vmem>>, vector<1x8x256xf32>,
    return
  }
  func.func @transform_0(%arg0: i32, %arg1: i32) -> (i32, i32) {
    %c0_i32 = arith.constant 0 : i32
    %c0_i32_0 = arith.constant 0 : i32
    %c0_i32_1 = arith.constant 0 : i32
    return %c0_i32, %c0_i32_0 : i32, i32
  }
  func.func @transform_1(%arg0: i32, %arg1: i32) -> (i32, i32) {
    %c0_i32 = arith.constant 0 : i32
    %c0_i32_0 = arith.constant 0 : i32
    %c0_i32_1 = arith.constant 0 : i32
    return %c0_i32, %c0_i32_0 : i32, i32
  }
  func.func @transform_2(%arg0: i32, %arg1: i32) -> (i32, i32, i32) {
    %c0_i32 = arith.constant 0 : i32
    %c0_i32_0 = arith.constant 0 : i32
    return %arg0, %c0_i32, %arg1 : i32, i32, i32
  }
  func.func @transform_3(%arg0: i32, %arg1: i32) -> (i32, i32, i32) {
    %c0_i32 = arith.constant 0 : i32
    %c0_i32_0 = arith.constant 0 : i32
    return %arg0, %c0_i32, %arg1 : i32, i32, i32
  }
}

module attributes {stable_mosaic.version = 11 : i64} {
  func.func @_resize_block_kernel(%arg0: i32, %arg1: memref<12x16xf32, #tpu.memory_space<vmem>>, %arg2: memref<16x12xf32, #tpu.memory_space<vmem>>, %arg3: memref<4x16x16xf32, #tpu.memory_space<vmem>>, %arg4: memref<4x12x12xf32, #tpu.memory_space<vmem>>) attributes {dimension_semantics = [#tpu.dimension_semantics<parallel>], iteration_bounds = array<i64: 2>, scalar_prefetch = 0 : i64, scratch_operands = 0 : i64, tpu.core_type = #tpu.core_type<tc>, window_params = [{pipeline_mode = #tpu.pipeline_mode<synchronous>, transform_indices = @transform_0, window_bounds = array<i64: 12, 16>}, {pipeline_mode = #tpu.pipeline_mode<synchronous>, transform_indices = @transform_1, window_bounds = array<i64: 16, 12>}, {transform_indices = @transform_2, window_bounds = array<i64: 4, 16, 16>}, {transform_indices = @transform_3, window_bounds = array<i64: 4, 12, 12>}]} {
    %c0 = arith.constant 0 : index
    %c0_0 = arith.constant 0 : index
    %0 = vector.load %arg2[%c0, %c0_0] : memref<16x12xf32, #tpu.memory_space<vmem>>, vector<16x12xf32>
    %1 = vector.shape_cast %0 : vector<16x12xf32> to vector<1x16x12xf32>
    %2 = vector.broadcast %1 : vector<1x16x12xf32> to vector<4x16x12xf32>
    %c0_1 = arith.constant 0 : index
    %c0_2 = arith.constant 0 : index
    %3 = vector.load %arg1[%c0_1, %c0_2] : memref<12x16xf32, #tpu.memory_space<vmem>>, vector<12x16xf32>
    %4 = vector.shape_cast %3 : vector<12x16xf32> to vector<1x12x16xf32>
    %5 = vector.broadcast %4 : vector<1x12x16xf32> to vector<4x12x16xf32>
    %c0_3 = arith.constant 0 : index
    %c0_4 = arith.constant 0 : index
    %c0_5 = arith.constant 0 : index
    %6 = vector.load %arg3[%c0_3, %c0_4, %c0_5] : memref<4x16x16xf32, #tpu.memory_space<vmem>>, vector<4x16x16xf32>
    "tpu.trace_start"() <{level = 10 : i32, message = "phw,pwv->phv"}> : () -> ()
    %cst = arith.constant dense<0.000000e+00> : vector<4x16x12xf32>
    %7 = tpu.matmul %6, %2, %cst {dimension_numbers = #tpu.dot_dimension_numbers<[2], [1], [1], [2], [0, 0, 0, 1, 1, 2], [0], [0]>} : vector<4x16x16xf32>, vector<4x16x12xf32>, vector<4x16x12xf32> -> vector<4x16x12xf32>
    "tpu.trace_stop"() : () -> ()
    "tpu.trace_start"() <{level = 10 : i32, message = "poh,phv->pov"}> : () -> ()
    %cst_6 = arith.constant dense<0.000000e+00> : vector<4x12x12xf32>
    %8 = tpu.matmul %5, %7, %cst_6 {dimension_numbers = #tpu.dot_dimension_numbers<[2], [1], [1], [2], [0, 0, 0, 1, 1, 2], [0], [0]>} : vector<4x12x16xf32>, vector<4x16x12xf32>, vector<4x12x12xf32> -> vector<4x12x12xf32>
    "tpu.trace_stop"() : () -> ()
    %c0_7 = arith.constant 0 : index
    %c0_8 = arith.constant 0 : index
    %c0_9 = arith.constant 0 : index
    %9 = vector.load %arg4[%c0_7, %c0_8, %c0_9] : memref<4x12x12xf32, #tpu.memory_space<vmem>>, vector<4x12x12xf32>
    tpu.vector_store %arg4[%c0_7, %c0_8, %c0_9], %8 {strides = array<i32>} : memref<4x12x12xf32, #tpu.memory_space<vmem>>, vector<4x12x12xf32>,
    return
  }
  func.func @transform_0(%arg0: i32) -> (i32, i32) {
    %c0_i32 = arith.constant 0 : i32
    %c0_i32_0 = arith.constant 0 : i32
    %c0_i32_1 = arith.constant 0 : i32
    return %c0_i32, %c0_i32_0 : i32, i32
  }
  func.func @transform_1(%arg0: i32) -> (i32, i32) {
    %c0_i32 = arith.constant 0 : i32
    %c0_i32_0 = arith.constant 0 : i32
    %c0_i32_1 = arith.constant 0 : i32
    return %c0_i32, %c0_i32_0 : i32, i32
  }
  func.func @transform_2(%arg0: i32) -> (i32, i32, i32) {
    %c0_i32 = arith.constant 0 : i32
    %c0_i32_0 = arith.constant 0 : i32
    %c0_i32_1 = arith.constant 0 : i32
    return %arg0, %c0_i32, %c0_i32_0 : i32, i32, i32
  }
  func.func @transform_3(%arg0: i32) -> (i32, i32, i32) {
    %c0_i32 = arith.constant 0 : i32
    %c0_i32_0 = arith.constant 0 : i32
    %c0_i32_1 = arith.constant 0 : i32
    return %arg0, %c0_i32, %c0_i32_0 : i32, i32, i32
  }
}

module attributes {stable_mosaic.version = 11 : i64} {
  func.func @_conv1x1_kernel(%arg0: i32, %arg1: i32, %arg2: memref<8x4xf32, #tpu.memory_space<vmem>>, %arg3: memref<8x1xf32, #tpu.memory_space<vmem>>, %arg4: memref<1x4x144xf32, #tpu.memory_space<vmem>>, %arg5: memref<1x8x144xf32, #tpu.memory_space<vmem>>) attributes {dimension_semantics = [#tpu.dimension_semantics<parallel>, #tpu.dimension_semantics<parallel>], iteration_bounds = array<i64: 2, 1>, scalar_prefetch = 0 : i64, scratch_operands = 0 : i64, tpu.core_type = #tpu.core_type<tc>, window_params = [{pipeline_mode = #tpu.pipeline_mode<synchronous>, transform_indices = @transform_0, window_bounds = array<i64: 8, 4>}, {pipeline_mode = #tpu.pipeline_mode<synchronous>, transform_indices = @transform_1, window_bounds = array<i64: 8, 1>}, {transform_indices = @transform_2, window_bounds = array<i64: 1, 4, 144>}, {transform_indices = @transform_3, window_bounds = array<i64: 1, 8, 144>}]} {
    %c0 = arith.constant 0 : index
    %c0_0 = arith.constant 0 : index
    %0 = vector.load %arg2[%c0, %c0_0] : memref<8x4xf32, #tpu.memory_space<vmem>>, vector<8x4xf32>
    %c0_1 = arith.constant 0 : index
    %c0_2 = arith.constant 0 : index
    %c0_3 = arith.constant 0 : index
    %1 = vector.load %arg4[%c0_1, %c0_2, %c0_3] : memref<1x4x144xf32, #tpu.memory_space<vmem>>, vector<1x4x144xf32>
    %2 = vector.shape_cast %1 : vector<1x4x144xf32> to vector<4x144xf32>
    %cst = arith.constant dense<0.000000e+00> : vector<8x144xf32>
    %3 = tpu.matmul %0, %2, %cst {dimension_numbers = #tpu.dot_dimension_numbers<[1], [0], [0], [1], [0, 0, 1, 1], [], []>} : vector<8x4xf32>, vector<4x144xf32>, vector<8x144xf32> -> vector<8x144xf32>
    %c0_4 = arith.constant 0 : index
    %c0_5 = arith.constant 0 : index
    %4 = vector.load %arg3[%c0_4, %c0_5] : memref<8x1xf32, #tpu.memory_space<vmem>>, vector<8x1xf32>
    %5 = vector.broadcast %4 : vector<8x1xf32> to vector<8x144xf32>
    %6 = arith.addf %3, %5 : vector<8x144xf32>
    %c0_6 = arith.constant 0 : index
    %c0_7 = arith.constant 0 : index
    %c0_8 = arith.constant 0 : index
    %7 = vector.load %arg5[%c0_6, %c0_7, %c0_8] : memref<1x8x144xf32, #tpu.memory_space<vmem>>, vector<1x8x144xf32>
    %8 = vector.shape_cast %7 : vector<1x8x144xf32> to vector<8x144xf32>
    %9 = vector.shape_cast %6 : vector<8x144xf32> to vector<1x8x144xf32>
    tpu.vector_store %arg5[%c0_6, %c0_7, %c0_8], %9 {strides = array<i32>} : memref<1x8x144xf32, #tpu.memory_space<vmem>>, vector<1x8x144xf32>,
    return
  }
  func.func @transform_0(%arg0: i32, %arg1: i32) -> (i32, i32) {
    %c0_i32 = arith.constant 0 : i32
    %c0_i32_0 = arith.constant 0 : i32
    %c0_i32_1 = arith.constant 0 : i32
    return %c0_i32, %c0_i32_0 : i32, i32
  }
  func.func @transform_1(%arg0: i32, %arg1: i32) -> (i32, i32) {
    %c0_i32 = arith.constant 0 : i32
    %c0_i32_0 = arith.constant 0 : i32
    %c0_i32_1 = arith.constant 0 : i32
    return %c0_i32, %c0_i32_0 : i32, i32
  }
  func.func @transform_2(%arg0: i32, %arg1: i32) -> (i32, i32, i32) {
    %c0_i32 = arith.constant 0 : i32
    %c0_i32_0 = arith.constant 0 : i32
    return %arg0, %c0_i32, %arg1 : i32, i32, i32
  }
  func.func @transform_3(%arg0: i32, %arg1: i32) -> (i32, i32, i32) {
    %c0_i32 = arith.constant 0 : i32
    %c0_i32_0 = arith.constant 0 : i32
    return %arg0, %c0_i32, %arg1 : i32, i32, i32
  }
}

module attributes {stable_mosaic.version = 11 : i64} {
  func.func @_upsample_max_kernel(%arg0: i32, %arg1: memref<16x12xf32, #tpu.memory_space<vmem>>, %arg2: memref<12x16xf32, #tpu.memory_space<vmem>>, %arg3: memref<8x12x12xf32, #tpu.memory_space<vmem>>, %arg4: memref<8x16x16xf32, #tpu.memory_space<vmem>>, %arg5: memref<8x16x16xf32, #tpu.memory_space<vmem>>) attributes {dimension_semantics = [#tpu.dimension_semantics<parallel>], iteration_bounds = array<i64: 2>, scalar_prefetch = 0 : i64, scratch_operands = 0 : i64, tpu.core_type = #tpu.core_type<tc>, window_params = [{pipeline_mode = #tpu.pipeline_mode<synchronous>, transform_indices = @transform_0, window_bounds = array<i64: 16, 12>}, {pipeline_mode = #tpu.pipeline_mode<synchronous>, transform_indices = @transform_1, window_bounds = array<i64: 12, 16>}, {transform_indices = @transform_2, window_bounds = array<i64: 8, 12, 12>}, {transform_indices = @transform_3, window_bounds = array<i64: 8, 16, 16>}, {transform_indices = @transform_4, window_bounds = array<i64: 8, 16, 16>}]} {
    %c0 = arith.constant 0 : index
    %c0_0 = arith.constant 0 : index
    %0 = vector.load %arg2[%c0, %c0_0] : memref<12x16xf32, #tpu.memory_space<vmem>>, vector<12x16xf32>
    %1 = vector.shape_cast %0 : vector<12x16xf32> to vector<1x12x16xf32>
    %2 = vector.broadcast %1 : vector<1x12x16xf32> to vector<8x12x16xf32>
    %c0_1 = arith.constant 0 : index
    %c0_2 = arith.constant 0 : index
    %3 = vector.load %arg1[%c0_1, %c0_2] : memref<16x12xf32, #tpu.memory_space<vmem>>, vector<16x12xf32>
    %4 = vector.shape_cast %3 : vector<16x12xf32> to vector<1x16x12xf32>
    %5 = vector.broadcast %4 : vector<1x16x12xf32> to vector<8x16x12xf32>
    %c0_3 = arith.constant 0 : index
    %c0_4 = arith.constant 0 : index
    %c0_5 = arith.constant 0 : index
    %6 = vector.load %arg3[%c0_3, %c0_4, %c0_5] : memref<8x12x12xf32, #tpu.memory_space<vmem>>, vector<8x12x12xf32>
    "tpu.trace_start"() <{level = 10 : i32, message = "phw,pwv->phv"}> : () -> ()
    %cst = arith.constant dense<0.000000e+00> : vector<8x12x16xf32>
    %7 = tpu.matmul %6, %2, %cst {dimension_numbers = #tpu.dot_dimension_numbers<[2], [1], [1], [2], [0, 0, 0, 1, 1, 2], [0], [0]>} : vector<8x12x12xf32>, vector<8x12x16xf32>, vector<8x12x16xf32> -> vector<8x12x16xf32>
    "tpu.trace_stop"() : () -> ()
    "tpu.trace_start"() <{level = 10 : i32, message = "poh,phv->pov"}> : () -> ()
    %cst_6 = arith.constant dense<0.000000e+00> : vector<8x16x16xf32>
    %8 = tpu.matmul %5, %7, %cst_6 {dimension_numbers = #tpu.dot_dimension_numbers<[2], [1], [1], [2], [0, 0, 0, 1, 1, 2], [0], [0]>} : vector<8x16x12xf32>, vector<8x12x16xf32>, vector<8x16x16xf32> -> vector<8x16x16xf32>
    "tpu.trace_stop"() : () -> ()
    %c0_7 = arith.constant 0 : index
    %c0_8 = arith.constant 0 : index
    %c0_9 = arith.constant 0 : index
    %9 = vector.load %arg4[%c0_7, %c0_8, %c0_9] : memref<8x16x16xf32, #tpu.memory_space<vmem>>, vector<8x16x16xf32>
    %10 = arith.maximumf %8, %9 : vector<8x16x16xf32>
    %c0_10 = arith.constant 0 : index
    %c0_11 = arith.constant 0 : index
    %c0_12 = arith.constant 0 : index
    %11 = vector.load %arg5[%c0_10, %c0_11, %c0_12] : memref<8x16x16xf32, #tpu.memory_space<vmem>>, vector<8x16x16xf32>
    tpu.vector_store %arg5[%c0_10, %c0_11, %c0_12], %10 {strides = array<i32>} : memref<8x16x16xf32, #tpu.memory_space<vmem>>, vector<8x16x16xf32>,
    return
  }
  func.func @transform_0(%arg0: i32) -> (i32, i32) {
    %c0_i32 = arith.constant 0 : i32
    %c0_i32_0 = arith.constant 0 : i32
    %c0_i32_1 = arith.constant 0 : i32
    return %c0_i32, %c0_i32_0 : i32, i32
  }
  func.func @transform_1(%arg0: i32) -> (i32, i32) {
    %c0_i32 = arith.constant 0 : i32
    %c0_i32_0 = arith.constant 0 : i32
    %c0_i32_1 = arith.constant 0 : i32
    return %c0_i32, %c0_i32_0 : i32, i32
  }
  func.func @transform_2(%arg0: i32) -> (i32, i32, i32) {
    %c0_i32 = arith.constant 0 : i32
    %c0_i32_0 = arith.constant 0 : i32
    %c0_i32_1 = arith.constant 0 : i32
    return %arg0, %c0_i32, %c0_i32_0 : i32, i32, i32
  }
  func.func @transform_3(%arg0: i32) -> (i32, i32, i32) {
    %c0_i32 = arith.constant 0 : i32
    %c0_i32_0 = arith.constant 0 : i32
    %c0_i32_1 = arith.constant 0 : i32
    return %arg0, %c0_i32, %c0_i32_0 : i32, i32, i32
  }
  func.func @transform_4(%arg0: i32) -> (i32, i32, i32) {
    %c0_i32 = arith.constant 0 : i32
    %c0_i32_0 = arith.constant 0 : i32
    %c0_i32_1 = arith.constant 0 : i32
    return %arg0, %c0_i32, %c0_i32_0 : i32, i32, i32
  }
}

</mosaic_0001>

<bundles_post_ra>
// kernel: msc_forward.9
= control target key start
LH: loop header
LB: loop body
LE: loop exit
PB: predicated region body
PF: predicated region fallthrough
CT: control target
= control target key end

     0   :  { %s452_s12 = smov 0   ;;  %s454_s13 = smov 0   ;;  %s491_s0 = inlined_call_operand.vmem [shape: f32[8,4], index: 0, kind: input, shape index: {}]   ;;  %s492_s1 = inlined_call_operand.vmem [shape: f32[8,1], index: 1, kind: input, shape index: {}]   ;;  %s493_s2 = inlined_call_operand.vmem [shape: f32[2,4,64], index: 2, kind: input, shape index: {}]   ;;  %s494_s3 = inlined_call_operand.vmem [shape: f32[2,8,64], index: 3, kind: output, shape index: {}]  }
   0x1   :  { %s456_s14 = smov 0  }
   0x2 LB: > { %s25_s15 = sadd.s32 1, %s423_s13  ;;  %p363_p0 = scmp.ge.s32.totalorder %s427_s14, 1  ;;  %s427_s14 = sphi %s456_s14, %s13_s14   ;;  %s423_s13 = sphi %s454_s13, %s496_s13   ;;  %s419_s12 = sphi %s452_s12, %s495_s12  }
   0x3   : > { %p27_p1 = scmp.ge.s32.totalorder %s25_s15, 2  ;;  %p155_p2 = scmp.lt.s32.totalorder %s427_s14, 3 }
   0x5   : > { %s498_s15 = smov (%p27_p1, %s25_s15), 0  ;;  %p156_p3 = pnand %p363_p0, %p155_p2 }
   0x6   : > { %p183_p4 = scmp.lt.s32.totalorder (!%p156_p3), %s419_s12, 1  ;;  %v429_v0 = vmov (!%p156_p3), 0.0   ;;  %vm430_vm0 = vmmov (!%p156_p3), 0   ;;  %v199_v1 = vld [vmem:[%s492_s1] sm:$0xff] (!%p156_p3)  ;;  %v431_v2 = vmov (!%p156_p3), 0   ;;  %vm209_vm1 = vcmask (!%p156_p3), 1043456  }
   0x7   : > { %159 = sbr.rel (%p156_p3) target bundleno = 234 (0xea), region = 32  ;;  %372 = vmatprep.subr.mxu0 (!%p156_p3), %v429_v0  ;;  %374 = vmatprep.mubr.msk.f32.mxu0 (!%p156_p3), %vm430_vm0, %v429_v0  ;;  %v197_v3 = vld [vmem:[%s491_s0] sm:$0xff] (!%p156_p3)  ;;  %vm205_vm2 = vcmask (!%p156_p3), 31744   ;;  %vm283_vm3 = vcmask (!%p156_p3), 523264  }
   0x8   : > { %404 = vset.pattern.permute.xlu0 (!%p156_p3), %v431_v2 }
   0x9   : > { %202 = vperm.xlu0 (!%p156_p3), %404, %v199_v1  }
   0xe   : > { %s500_s12 = smov (!%p183_p4, %s419_s12), 1 }
   0xf   : > { %s364_s18 = sshll.u32 %s500_s12, 2  ;;  %s365_s24 = sshll.u32 %s500_s12, 3 }
  0x10   : > { %s189_s21 = scalar_lea.vmem %s493_s2, %s364_s18  ;;  %s196_s27 = scalar_lea.vmem %s494_s3, %s365_s24 }
  0x11   : > { %v198_v4 = vld [vmem:[%s189_s21] sm:$0xf] }
  0x12   : > { %373 = vmatpush3.msk.msra.mxu0 %vm209_vm1, %v198_v4 }
  0x13   : > { %375 = vmatmul.mubr.msk.f32.vlgmr.msra.gmra.mrb[0].mxu0 %vm205_vm2, %v197_v3 }
  0x88   : > { %v203_v5 = vpop.permute.xlu0 %202 }
  0xe6   : > { %v279_v6 = vpop.f32.mrb[0].mxu0 }
  0xe7   : > { %v280_v7 = vadd.f32 %v279_v6, %v203_v5  ;;  %v376_v8 = vpop.f32.mrb[1].mxu0 }
  0xe9   : > { %284 = vst.msk [vmem:[%s196_s27] sm:$0xff] %vm283_vm3, %v280_v7 }
  0xea PF: > { %s13_s14 = sadd.s32 1, %s427_s14   ;;  %s495_s12 = smov %s423_s13 }
  0xeb   : > { %p10_p5 = scmp.ge.s32.totalorder %s13_s14, 4   ;;  %s496_s13 = smov %s498_s15 }
  0xed   :  { %12 = sbr.rel (!%p10_p5) target bundleno = 2 (0x2), region = 62 }

// kernel: msc_forward.7
= control target key start
LH: loop header
LB: loop body
LE: loop exit
PB: predicated region body
PF: predicated region fallthrough
CT: control target
= control target key end

     0   :  { %s479_s12 = smov 0   ;;  %s481_s13 = smov 0   ;;  %s518_s0 = inlined_call_operand.vmem [shape: f32[8,4], index: 0, kind: input, shape index: {}]   ;;  %s519_s1 = inlined_call_operand.vmem [shape: f32[8,1], index: 1, kind: input, shape index: {}]   ;;  %s520_s2 = inlined_call_operand.vmem [shape: f32[2,4,256], index: 2, kind: input, shape index: {}]   ;;  %s521_s3 = inlined_call_operand.vmem [shape: f32[2,8,256], index: 3, kind: output, shape index: {}]  }
   0x1   :  { %s483_s14 = smov 0  }
   0x2 LB: > { %s25_s15 = sadd.s32 1, %s451_s13  ;;  %p393_p0 = scmp.ge.s32.totalorder %s455_s14, 1  ;;  %s455_s14 = sphi %s483_s14, %s13_s14   ;;  %s451_s13 = sphi %s481_s13, %s523_s13   ;;  %s447_s12 = sphi %s479_s12, %s522_s12  }
   0x3   : > { %p27_p1 = scmp.ge.s32.totalorder %s25_s15, 2  ;;  %p158_p2 = scmp.lt.s32.totalorder %s455_s14, 3 }
   0x5   : > { %s525_s15 = smov (%p27_p1, %s25_s15), 0  ;;  %p159_p3 = pnand %p393_p0, %p158_p2 }
   0x6   : > { %p191_p4 = scmp.lt.s32.totalorder (!%p159_p3), %s447_s12, 1  ;;  %v457_v0 = vmov (!%p159_p3), 0.0   ;;  %v458_v1 = vmov (!%p159_p3), 0   ;;  %v212_v2 = vld [vmem:[%s519_s1] sm:$0xff] (!%p159_p3)  ;;  %vm224_vm0 = vcmask (!%p159_p3), 1043456   ;;  %vm220_vm1 = vcmask (!%p159_p3), 31744  }
   0x7   : > { %162 = sbr.rel (%p159_p3) target bundleno = 238 (0xee), region = 32  ;;  %293 = vmatprep.mubr.f32.mxu0 (!%p159_p3), %v457_v0  ;;  %431 = vset.pattern.permute.xlu0 (!%p159_p3), %v458_v1  ;;  %v210_v5 = vld [vmem:[%s518_s0] sm:$0xff] (!%p159_p3) }
   0x8   : > { %215 = vperm.xlu0 (!%p159_p3), %431, %v212_v2  }
   0xe   : > { %s527_s12 = smov (!%p191_p4, %s447_s12), 1 }
   0xf   : > { %s403_s18 = sshll.u32 %s527_s12, 3  ;;  %s404_s24 = sshll.u32 %s527_s12, 4 }
  0x10   : > { %s198_s21 = scalar_lea.vmem %s520_s2, %s403_s18  ;;  %s208_s27 = scalar_lea.vmem %s521_s3, %s404_s24 }
  0x11   : > { %v211_v3 = vld [vmem:[%s198_s21] sm:$0xff] }
  0x12   : > { %v219_v4 = vcombine.high %v211_v3, %v211_v3 }
  0x14   : > { %398 = vmatprep.subr.msk.mxu0 %vm224_vm0, %v219_v4 }
  0x15   : > { %399 = vmatpush1.msk.msra.mxu0 %vm224_vm0, %v211_v3 }
  0x16   : > { %400 = vmatmul.mubr.msk.f32.vlgmr.msra.gmra.mrb[0].mxu0 %vm220_vm1, %v210_v5 }
  0x87   : > { %v216_v6 = vpop.permute.xlu0 %215 }
  0xe9   : > { %v295_v7 = vpop.f32.mrb[0].mxu0 }
  0xea   : > { %v296_v8 = vadd.f32 %v295_v7, %v216_v6  ;;  %v297_v9 = vpop.f32.mrb[1].mxu0 }
  0xeb   : > { %v298_v10 = vadd.f32 %v297_v9, %v216_v6 }
  0xec   : > { %300 = vst [vmem:[%s208_s27] sm:$0xff] %v296_v8 }
  0xed   : > { %301 = vst [vmem:[%s208_s27 + $0x8] sm:$0xff] %v298_v10 }
  0xee PF: > { %s13_s14 = sadd.s32 1, %s455_s14   ;;  %s522_s12 = smov %s451_s13 }
  0xef   : > { %p10_p5 = scmp.ge.s32.totalorder %s13_s14, 4   ;;  %s523_s13 = smov %s525_s15 }
  0xf1   :  { %12 = sbr.rel (!%p10_p5) target bundleno = 2 (0x2), region = 62 }

// kernel: msc_forward.8
= control target key start
LH: loop header
LB: loop body
LE: loop exit
PB: predicated region body
PF: predicated region fallthrough
CT: control target
= control target key end

     0   :  { %8 = vsyncpa [#allocation3], 0  ;;  %s1293_s0 = inlined_call_operand.vmem [shape: f32[8,16], index: 0, kind: input, shape index: {}]   ;;  %s1294_s1 = inlined_call_operand.vmem [shape: f32[16,8], index: 1, kind: input, shape index: {}]   ;;  %s1295_s2 = inlined_call_operand.hbm [shape: f32[8,16,16], index: 2, kind: input, shape index: {}]   ;;  %s1296_s3 = inlined_call_operand.vmem [shape: f32[8,8,8], index: 3, kind: output, shape index: {}]  }
   0x1   :  { %10 = vsyncpa [#allocation3 + $0x1], 0  ;;  %s1161_s12 = smov 0   ;;  %s1163_s13 = smov 0  }
   0x2   :  { %s1165_s14 = smov 0   ;;  %s1167_s15 = smov 0  }
   0x3 LB: > { %s885_s16 = sadd.s32 4294967295, %s1133_s15   ;;  %s1181_s17 = sadd.s32 1, %s1133_s15   ;;  %s1133_s15 = sphi %s1167_s15, %s1303_s15   ;;  %s1129_s14 = sphi %s1165_s14, %s1302_s14   ;;  %s1125_s13 = sphi %s1163_s13, %s1301_s13   ;;  %s1121_s12 = sphi %s1161_s12, %s1300_s12  }
   0x4   : > { %s62_s18 = ssub.s32 %s1133_s15, %s1181_s17  ;;  %s65_s19 = sadd.s32 1, %s1129_s14 }
   0x5   : > { %p63_p0 = scmp.eq.s32.totalorder %s62_s18, 0  ;;  %p72_p1 = scmp.ne.s32.totalorder %s1129_s14, %s1125_s13 }
   0x6   : > { %p73_p2 = scmp.eq.s32.totalorder %s1133_s15, 0  ;;  %p78_p3 = scmp.ne.s32.totalorder %s1125_s13, %s1121_s12 }
   0x7   : > { %s1191_s20 = scalar_select %p63_p0, %s1129_s14, %s65_s19  }
   0x8   : > { %p74_p4 = por %p73_p2, %p72_p1  ;;  %p79_p5 = scmp.eq.s32.totalorder %s885_s16, 0 }
   0x9   : > { %p1031_p6 = scmp.lt.s32.totalorder %s1133_s15, 2  ;;  %s134_s22 = sand.u32 1, %s1129_s14  }
   0xa   : > { %p1196_p7 = por %p79_p5, %p78_p3  ;;  %s889_s23 = sshll.u32 %s134_s22, 6 }
   0xb   : > { %s912_s24 = sshll.u32 %s1133_s15, 10  ;;  %s138_s28 = scalar_lea.vmem [#allocation2], %s889_s23 }
   0xc   : > { %s1205_s27 = scalar_lea.hbm %s1295_s2, %s912_s24  ;;  %s146_s29 = sshll.u32 %s138_s28, 4  ;;  %s1207_s29 = int_to_ptr.vmem [resolvable:$true] %s146_s29 }
   0xd   : > { %p1209_p8 = pnand %p1031_p6, %p74_p4  ;;  %s1214_s4 = scalar_lea.sflag [#allocation3], %s134_s22 }
   0xe   : > { %s1069_s5 = scalar_lea.hbm %s1205_s27, 1024  ;;  %s1074_s8 = scalar_lea.hbm %s1295_s2, 2048 }
   0xf   : > { %p1070_p10 = scmp.ne.s32.totalorder %s1205_s27, %s1069_s5  ;;  %p1071_p11 = pneg %p1209_p8 }
  0x10   : > { %p1075_p0 = scmp.lt.u32.totalorder %s1205_s27, %s1295_s2  ;;  %p1076_p1 = scmp.lt.u32.totalorder %s1074_s8, %s1069_s5 }
  0x11   : > { %p1072_p12 = pnand %p1071_p11, %p1070_p10  ;;  %p1078_p3 = scmp.lt.u32.totalorder %s1069_s5, %s1205_s27 }
  0x12   : > { %p1077_p2 = por %p1076_p1, %p1075_p0 }
  0x13   : > { %p1073_p13 = pneg %p1072_p12 }
  0x14   : > { %p1079_p4 = por %p1078_p3, %p1077_p2 }
  0x16   : > { %p1080_p5 = pnand %p1079_p4, %p1073_p13 }
  0x18   : > { %1083 = shalt.err (!%p1080_p5)
}
  0x19   : > { %s1084_s11 = scalar_lea.vmem %s1207_s29, 1024  ;;  %s1135_s12 = smov [#allocation2]  }
  0x1a   : > { %p1085_p6 = scmp.ne.s32.totalorder %s1207_s29, %s1084_s11  ;;  %s1089_s18 = sshll.u32 %s1135_s12, 4  ;;  %s1090_s18 = int_to_ptr.vmem [resolvable:$false] %s1089_s18 }
  0x1b   : > { %s1091_s19 = scalar_lea.vmem %s1090_s18, 2048  ;;  %p1092_p9 = scmp.lt.s32.totalorder %s1207_s29, %s1090_s18 }
  0x1c   : > { %p1087_p10 = pnand %p1085_p6, %p1071_p11  ;;  %p1093_p0 = scmp.lt.s32.totalorder %s1091_s19, %s1084_s11 }
  0x1e   : > { %p1088_p12 = pneg %p1087_p10  ;;  %p1094_p1 = por %p1093_p0, %p1092_p9 }
  0x20   : > { %p1095_p2 = pnand %p1094_p1, %p1088_p12 }
  0x22   : > { %1098 = shalt.err (!%p1095_p2)
}
  0x23   : > { %s1136_s22 = smov 128   ;;  %s1137_s23 = smov 8  }
  0x24   : > { %1030 = dma.hbm_to_vmem [thread:$0]  (!%p1209_p8), %s1205_s27, 1024, %s1207_s29, %s1214_s4, %s1136_s22, %s1136_s22, %s1137_s23  }
  0x25   : > { %p154_p11 = scmp.lt.s32.totalorder %s1133_s15, 3  ;;  %p1299_p13 = scmp.ge.s32.totalorder %s1133_s15, 1 }
  0x27   : > { %p155_p3 = pnand %p1299_p13, %p154_p11 }
  0x28   : > { %s160_s24 = sand.u32 (!%p155_p3), 1, %s1125_s13  }
  0x29   : > { %158 = sbr.rel (%p155_p3) target bundleno = 491 (0x1eb), region = 32  ;;  %s894_s25 = sshll.u32 (!%p155_p3), %s160_s24, 6 }
  0x2a   : > { %s161_s26 = scalar_lea.sflag (!%p155_p3), [#allocation3], %s160_s24  ;;  %s164_s28 = scalar_lea.vmem (!%p155_p3), [#allocation2], %s894_s25 }
  0x30   : > { %1116 = dma.done.wait (%p1196_p7), %s161_s26, 1024  }
  0x31   : > { %1118 = vsyncadd (%p1196_p7), %s161_s26, 4294966272  ;;  %vm205_vm0 = vcmask 130048   ;;  %v194_v0 = vld [vmem:[%s1294_s1] sm:$0xff]  ;;  %v195_v1 = vld [vmem:[%s1294_s1 + $0x8] sm:$0xff]  ;;  %v1138_v11 = vmov 0.0|0.0   ;;  %vm1139_vm1 = vmmov 0  }
  0x32   : > { %v197_v2 = vld [vmem:[%s164_s28] sm:$0xff]  ;;  %v997_v3 = vpack.c.bf16 %v195_v1, %v194_v0  ;;  %v199_v4 = vld [vmem:[%s164_s28 + $0x10] sm:$0xff]  ;;  %v198_v5 = vld [vmem:[%s164_s28 + $0x8] sm:$0xff]  ;;  %v1140_v12 = vmov 0.0   ;;  %s895_s4 = sshll.u32 %s885_s16, 2  ;;  %vm813_vm2 = vcmask 64512  }
  0x33   : > { %945 = vmatprep.mubr.msk.f32.mxu0 %vm205_vm0, %v197_v2  ;;  %952 = vmatprep.mubr.msk.f32.mxu1 %vm205_vm0, %v199_v4  ;;  %v200_v6 = vld [vmem:[%s164_s28 + $0x18] sm:$0xff]  ;;  %v201_v7 = vld [vmem:[%s164_s28 + $0x20] sm:$0xff]  ;;  %v203_v8 = vld [vmem:[%s164_s28 + $0x30] sm:$0xff]  ;;  %p189_p7 = scmp.lt.s32.totalorder %s895_s4, 7 }
  0x34   : > { %998 = vmatprep.subr.bf16.mxu0 %v997_v3  ;;  %1002 = vmatprep.subr.bf16.mxu1 %v997_v3  ;;  %v202_v9 = vld [vmem:[%s164_s28 + $0x28] sm:$0xff]  ;;  %v204_v10 = vld [vmem:[%s164_s28 + $0x38] sm:$0xff]  ;;  %v196_v21 = vld [vmem:[%s1293_s0] sm:$0xff] }
  0x35   : > { %1000 = vmatpush3.bf16.msra.mxu0 %v997_v3  ;;  %1004 = vmatpush3.bf16.msra.mxu1 %v997_v3  ;;  %s1305_s4 = smov (!%p189_p7, %s895_s4), 7 }
  0x36   : > { %1006 = vmatprep.subr.bf16.mxu0 %v997_v3  ;;  %1010 = vmatprep.subr.bf16.mxu1 %v997_v3  ;;  %s896_s7 = sshll.u32 %s1305_s4, 3 }
  0x37   : > { %s192_s10 = scalar_lea.vmem %s1296_s3, %s896_s7 }
  0x38   : > { %946 = vmatmul.mubr.msk.f32.vlgmr.msra.gmra.mrb[0].mxu0 %vm205_vm0, %v198_v5  ;;  %953 = vmatmul.mubr.msk.f32.vlgmr.msra.gmra.mrb[0].mxu1 %vm205_vm0, %v200_v6 }
  0x39   : > { %1008 = vmatpush3.bf16.msra.mxu0 %v997_v3  ;;  %1012 = vmatpush3.bf16.msra.mxu1 %v997_v3 }
  0x3a   : > { %959 = vmatprep.mubr.msk.f32.mxu0 %vm205_vm0, %v201_v7  ;;  %966 = vmatprep.mubr.msk.f32.mxu1 %vm205_vm0, %v203_v8 }
  0x3b   : > { %1013 = vmatprep.subr.bf16.mxu0 %v1138_v11  ;;  %1016 = vmatprep.subr.bf16.mxu1 %v1138_v11 }
  0x3c   : > { %960 = vmatmul.mubr.msk.f32.vlgmr.msra.gmra.mrb[2].mxu0 %vm205_vm0, %v202_v9  ;;  %967 = vmatmul.mubr.msk.f32.vlgmr.msra.gmra.mrb[2].mxu1 %vm205_vm0, %v204_v10 }
  0x3d   : > { %973 = vmatprep.mubr.msk.f32.mxu0 %vm1139_vm1, %v1140_v12  ;;  %980 = vmatprep.mubr.msk.f32.mxu1 %vm1139_vm1, %v1140_v12 }
 0x10b   : > { %v947_v13 = vpop.f32.mrb[0].mxu0  ;;  %v954_v14 = vpop.f32.mrb[0].mxu1 }
 0x10c   : > { %v278_v15 = vpop.f32.mrb[1].mxu0  ;;  %v359_v16 = vpop.f32.mrb[1].mxu1 }
 0x10d   : > { %v1014_v17 = vpack.c.bf16 %v947_v13, %v278_v15  ;;  %v1017_v18 = vpack.c.bf16 %v954_v14, %v359_v16 }
 0x10f   : > { %v961_v19 = vpop.f32.mrb[2].mxu0  ;;  %v968_v20 = vpop.f32.mrb[2].mxu1  ;;  %1015 = vmatpush3.bf16.msra.mxu0 %v1014_v17  ;;  %1018 = vmatpush3.bf16.msra.mxu1 %v1017_v18 }
 0x110   : > { %v440_v22 = vpop.f32.mrb[3].mxu0  ;;  %v521_v23 = vpop.f32.mrb[3].mxu1  ;;  %1019 = vmatprep.subr.bf16.mxu0 %v1138_v11  ;;  %1022 = vmatprep.subr.bf16.mxu1 %v1138_v11 }
 0x111   : > { %v1020_v24 = vpack.c.bf16 %v961_v19, %v440_v22  ;;  %v1023_v25 = vpack.c.bf16 %v968_v20, %v521_v23 }
 0x112   : > { %974 = vmatmul.mubr.msk.f32.vlgmr.msra.gmra.mrb[4].mxu0 %vm205_vm0, %v196_v21  ;;  %981 = vmatmul.mubr.msk.f32.vlgmr.msra.gmra.mrb[4].mxu1 %vm205_vm0, %v196_v21 }
 0x113   : > { %1021 = vmatpush3.bf16.msra.mxu0 %v1020_v24  ;;  %1024 = vmatpush3.bf16.msra.mxu1 %v1023_v25 }
 0x114   : > { %987 = vmatprep.mubr.msk.f32.mxu0 %vm1139_vm1, %v1140_v12  ;;  %994 = vmatprep.mubr.msk.f32.mxu1 %vm1139_vm1, %v1140_v12 }
 0x116   : > { %988 = vmatmul.mubr.msk.f32.vlgmr.msra.gmra.mrb[6].mxu0 %vm205_vm0, %v196_v21  ;;  %995 = vmatmul.mubr.msk.f32.vlgmr.msra.gmra.mrb[6].mxu1 %vm205_vm0, %v196_v21 }
 0x1e5   : > { %v599_v26 = vpop.f32.mrb[4].mxu0  ;;  %v669_v27 = vpop.f32.mrb[4].mxu1 }
 0x1e6   : > { %814 = vst.msk [vmem:[%s192_s10] sm:$0xff] %vm813_vm2, %v599_v26  ;;  %v975_v28 = vpop.f32.mrb[5].mxu0  ;;  %v982_v29 = vpop.f32.mrb[5].mxu1  ;;  %815 = vst.msk [vmem:[%s192_s10 + $0x8] sm:$0xff] %vm813_vm2, %v669_v27 }
 0x1e9   : > { %v739_v30 = vpop.f32.mrb[6].mxu0  ;;  %v809_v31 = vpop.f32.mrb[6].mxu1 }
 0x1ea   : > { %816 = vst.msk [vmem:[%s192_s10 + $0x10] sm:$0xff] %vm813_vm2, %v739_v30  ;;  %v989_v32 = vpop.f32.mrb[7].mxu0  ;;  %v996_v33 = vpop.f32.mrb[7].mxu1  ;;  %817 = vst.msk [vmem:[%s192_s10 + $0x18] sm:$0xff] %vm813_vm2, %v809_v31 }
 0x1eb PF: > { %p13_p8 = scmp.ge.s32.totalorder %s1181_s17, 4   ;;  %s1300_s12 = smov %s1125_s13 }
 0x1ec   : > { %s1301_s13 = smov %s1129_s14  ;;  %s1302_s14 = smov %s1191_s20 }
 0x1ed   : > { %s1303_s15 = smov %s1181_s17  ;;  %15 = sbr.rel (!%p13_p8) target bundleno = 3 (0x3), region = 72 }
 0x1f4   :  { %840 = vsyncpa [#allocation3], 1 }
 0x1f5   :  { %842 = vsyncpa [#allocation3 + $0x1], 1 }

// kernel: msc_forward.10
= control target key start
LH: loop header
LB: loop body
LE: loop exit
PB: predicated region body
PF: predicated region fallthrough
CT: control target
= control target key end

     0   :  { %s1755_s15 = smov 0   ;;  %s1854_s0 = inlined_call_operand.vmem [shape: f32[16,8], index: 0, kind: input, shape index: {}]   ;;  %s1855_s1 = inlined_call_operand.vmem [shape: f32[8,16], index: 1, kind: input, shape index: {}]   ;;  %s1856_s2 = inlined_call_operand.vmem [shape: f32[16,8,8], index: 2, kind: input, shape index: {}]   ;;  %s1857_s3 = inlined_call_operand.vmem [shape: f32[16,16,16], index: 3, kind: input, shape index: {}, may-alias: {3,4}]   ;;  %s1858_s4 = inlined_call_operand.vmem [shape: f32[16,16,16], index: 4, kind: output, shape index: {}, may-alias: {3,4}]  }
   0x1 LB: > { %s1549_s16 = sadd.s32 4294967295, %s1726_s15   ;;  %p1553_p0 = scmp.ge.s32.totalorder %s1726_s15, 1  ;;  %s1726_s15 = sphi %s1755_s15, %s14_s15  }
   0x2   : > { %p175_p1 = scmp.lt.s32.totalorder %s1726_s15, 3 }
   0x4   : > { %p176_p2 = pnand %p1553_p0, %p175_p1 }
   0x5   : > { %v228_v0 = vld [vmem:[%s1855_s1] sm:$0xff] (!%p176_p2)  ;;  %s1554_s19 = sshll.u32 (!%p176_p2), %s1549_s16, 3  ;;  %v1728_v1 = vmov (!%p176_p2), 0.0   ;;  %vm1729_vm0 = vmmov (!%p176_p2), 0   ;;  %vm239_vm1 = vcmask (!%p176_p2), 64512   ;;  %v230_v13 = vld [vmem:[%s1854_s0 + $0x8] sm:$0xff] (!%p176_p2) }
   0x6   : > { %179 = sbr.rel (%p176_p2) target bundleno = 459 (0x1cb), region = 36  ;;  %1630 = vmatprep.subr.mxu0 (!%p176_p2), %v1728_v1  ;;  %1635 = vmatprep.subr.mxu1 (!%p176_p2), %v1728_v1  ;;  %p209_p3 = scmp.lt.s32.totalorder (!%p176_p2), %s1554_s19, 15  ;;  %v229_v10 = vld [vmem:[%s1854_s0] sm:$0xff] (!%p176_p2)  ;;  %vm1462_vm2 = vcmask (!%p176_p2), 130048  }
   0x7   : > { %1631 = vmatpush3.msra.mxu0 (!%p176_p2), %v228_v0  ;;  %1632 = vmatprep.mubr.msk.f32.mxu0 (!%p176_p2), %vm1729_vm0, %v1728_v1 }
   0x8   : > { %1636 = vmatpush3.msra.mxu1 (!%p176_p2), %v228_v0  ;;  %1637 = vmatprep.mubr.msk.f32.mxu1 (!%p176_p2), %vm1729_vm0, %v1728_v1 }
   0x9   : > { %1640 = vmatprep.subr.mxu0 (!%p176_p2), %v1728_v1  ;;  %1645 = vmatprep.subr.mxu1 (!%p176_p2), %v1728_v1 }
   0xd   : > { %s1860_s19 = smov (!%p209_p3, %s1554_s19), 15 }
   0xe   : > { %s1555_s20 = sshll.u32 %s1860_s19, 3  ;;  %s1588_s28 = sshll.u32 %s1860_s19, 4 }
   0xf   : > { %s212_s23 = scalar_lea.vmem %s1856_s2, %s1555_s20  ;;  %s219_s5 = scalar_lea.vmem %s1857_s3, %s1588_s28 }
  0x10   : > { %v231_v2 = vld [vmem:[%s212_s23] sm:$0xff]  ;;  %v232_v3 = vld [vmem:[%s212_s23 + $0x8] sm:$0xff]  ;;  %v233_v4 = vld [vmem:[%s212_s23 + $0x10] sm:$0xff]  ;;  %s1817_s8 = scalar_lea.vmem %s1858_s4, %s1588_s28 }
  0x11   : > { %1633 = vmatmul.mubr.msk.f32.vlgmr.msra.gmra.mrb[0].mxu0 %vm239_vm1, %v231_v2  ;;  %1638 = vmatmul.mubr.msk.f32.vlgmr.msra.gmra.mrb[0].mxu1 %vm239_vm1, %v232_v3  ;;  %v234_v5 = vld [vmem:[%s212_s23 + $0x18] sm:$0xff]  ;;  %v235_v6 = vld [vmem:[%s212_s23 + $0x20] sm:$0xff]  ;;  %v236_v7 = vld [vmem:[%s212_s23 + $0x28] sm:$0xff] }
  0x12   : > { %1641 = vmatpush3.msra.mxu0 %v228_v0  ;;  %1642 = vmatprep.mubr.msk.f32.mxu0 %vm1729_vm0, %v1728_v1  ;;  %v237_v8 = vld [vmem:[%s212_s23 + $0x30] sm:$0xff]  ;;  %v238_v9 = vld [vmem:[%s212_s23 + $0x38] sm:$0xff]  ;;  %v1431_v28 = vld [vmem:[%s219_s5 + $0x8] sm:$0xff] }
  0x13   : > { %1646 = vmatpush3.msra.mxu1 %v228_v0  ;;  %1647 = vmatprep.mubr.msk.f32.mxu1 %vm1729_vm0, %v1728_v1  ;;  %v1433_v29 = vld [vmem:[%s219_s5 + $0x18] sm:$0xff]  ;;  %v1430_v30 = vld [vmem:[%s219_s5] sm:$0xff]  ;;  %v1432_v31 = vld [vmem:[%s219_s5 + $0x10] sm:$0xff] }
  0x14   : > { %1650 = vmatprep.subr.mxu0 %v1728_v1  ;;  %1655 = vmatprep.subr.mxu1 %v1728_v1  ;;  %v1435_v32 = vld [vmem:[%s219_s5 + $0x28] sm:$0xff]  ;;  %v1437_v33 = vld [vmem:[%s219_s5 + $0x38] sm:$0xff]  ;;  %v1434_v34 = vld [vmem:[%s219_s5 + $0x20] sm:$0xff] }
  0x15   : > { %1643 = vmatmul.mubr.msk.f32.vlgmr.msra.gmra.mrb[2].mxu0 %vm239_vm1, %v233_v4  ;;  %1648 = vmatmul.mubr.msk.f32.vlgmr.msra.gmra.mrb[2].mxu1 %vm239_vm1, %v234_v5  ;;  %v1436_v35 = vld [vmem:[%s219_s5 + $0x30] sm:$0xff]  ;;  %v1439_v36 = vld [vmem:[%s219_s5 + $0x48] sm:$0xff]  ;;  %v1441_v37 = vld [vmem:[%s219_s5 + $0x58] sm:$0xff] }
  0x16   : > { %1651 = vmatpush3.msra.mxu0 %v228_v0  ;;  %1652 = vmatprep.mubr.msk.f32.mxu0 %vm1729_vm0, %v1728_v1  ;;  %v1438_v38 = vld [vmem:[%s219_s5 + $0x40] sm:$0xff]  ;;  %v1440_v39 = vld [vmem:[%s219_s5 + $0x50] sm:$0xff]  ;;  %v1443_v40 = vld [vmem:[%s219_s5 + $0x68] sm:$0xff] }
  0x17   : > { %1656 = vmatpush3.msra.mxu1 %v228_v0  ;;  %1657 = vmatprep.mubr.msk.f32.mxu1 %vm1729_vm0, %v1728_v1  ;;  %v1445_v43 = vld [vmem:[%s219_s5 + $0x78] sm:$0xff]  ;;  %v1442_v44 = vld [vmem:[%s219_s5 + $0x60] sm:$0xff]  ;;  %v1444_v45 = vld [vmem:[%s219_s5 + $0x70] sm:$0xff] }
  0x18   : > { %1660 = vmatprep.subr.mxu0 %v1728_v1  ;;  %1665 = vmatprep.subr.mxu1 %v1728_v1 }
  0x19   : > { %1653 = vmatmul.mubr.msk.f32.vlgmr.msra.gmra.mrb[4].mxu0 %vm239_vm1, %v235_v6  ;;  %1658 = vmatmul.mubr.msk.f32.vlgmr.msra.gmra.mrb[4].mxu1 %vm239_vm1, %v236_v7 }
  0x1a   : > { %1661 = vmatpush3.msra.mxu0 %v228_v0  ;;  %1662 = vmatprep.mubr.msk.f32.mxu0 %vm1729_vm0, %v1728_v1 }
  0x1b   : > { %1666 = vmatpush3.msra.mxu1 %v228_v0  ;;  %1667 = vmatprep.mubr.msk.f32.mxu1 %vm1729_vm0, %v1728_v1 }
  0x1d   : > { %1663 = vmatmul.mubr.msk.f32.vlgmr.msra.gmra.mrb[6].mxu0 %vm239_vm1, %v237_v8  ;;  %1668 = vmatmul.mubr.msk.f32.vlgmr.msra.gmra.mrb[6].mxu1 %vm239_vm1, %v238_v9 }
  0x1e   : > { %1672 = vmatprep.mubr.msk.f32.mxu0 %vm239_vm1, %v229_v10  ;;  %1677 = vmatprep.mubr.msk.f32.mxu1 %vm239_vm1, %v229_v10 }
  0xe4   : > { %v309_v11 = vpop.f32.mrb[0].mxu0  ;;  %v382_v12 = vpop.f32.mrb[0].mxu1 }
  0xe5   : > { %v1634_v14 = vpop.f32.mrb[1].mxu0  ;;  %v1639_v15 = vpop.f32.mrb[1].mxu1  ;;  %1670 = vmatprep.subr.mxu0 %v309_v11  ;;  %1675 = vmatprep.subr.mxu1 %v382_v12 }
  0xe6   : > { %1671 = vmatpush3.msra.mxu0 %v309_v11  ;;  %1676 = vmatpush3.msra.mxu1 %v382_v12 }
  0xe7   : > { %1673 = vmatmul.mubr.msk.f32.vlgmr.msra.gmra.mrb[8].mxu0 %vm239_vm1, %v230_v13  ;;  %1678 = vmatmul.mubr.msk.f32.vlgmr.msra.gmra.mrb[8].mxu1 %vm239_vm1, %v230_v13 }
  0xe8   : > { %v455_v16 = vpop.f32.mrb[2].mxu0  ;;  %v528_v17 = vpop.f32.mrb[2].mxu1  ;;  %1682 = vmatprep.mubr.msk.f32.mxu0 %vm239_vm1, %v229_v10  ;;  %1687 = vmatprep.mubr.msk.f32.mxu1 %vm239_vm1, %v229_v10 }
  0xe9   : > { %v1644_v18 = vpop.f32.mrb[3].mxu0  ;;  %v1649_v19 = vpop.f32.mrb[3].mxu1  ;;  %1680 = vmatprep.subr.mxu0 %v455_v16  ;;  %1685 = vmatprep.subr.mxu1 %v528_v17 }
  0xea   : > { %1681 = vmatpush3.msra.mxu0 %v455_v16  ;;  %1686 = vmatpush3.msra.mxu1 %v528_v17 }
  0xeb   : > { %1683 = vmatmul.mubr.msk.f32.vlgmr.msra.gmra.mrb[10].mxu0 %vm239_vm1, %v230_v13  ;;  %1688 = vmatmul.mubr.msk.f32.vlgmr.msra.gmra.mrb[10].mxu1 %vm239_vm1, %v230_v13 }
  0xec   : > { %v601_v20 = vpop.f32.mrb[4].mxu0  ;;  %v674_v21 = vpop.f32.mrb[4].mxu1  ;;  %1692 = vmatprep.mubr.msk.f32.mxu0 %vm239_vm1, %v229_v10  ;;  %1697 = vmatprep.mubr.msk.f32.mxu1 %vm239_vm1, %v229_v10 }
  0xed   : > { %v1654_v22 = vpop.f32.mrb[5].mxu0  ;;  %v1659_v23 = vpop.f32.mrb[5].mxu1  ;;  %1690 = vmatprep.subr.mxu0 %v601_v20  ;;  %1695 = vmatprep.subr.mxu1 %v674_v21 }
  0xee   : > { %1691 = vmatpush3.msra.mxu0 %v601_v20  ;;  %1696 = vmatpush3.msra.mxu1 %v674_v21 }
  0xef   : > { %1693 = vmatmul.mubr.msk.f32.vlgmr.msra.gmra.mrb[12].mxu0 %vm239_vm1, %v230_v13  ;;  %1698 = vmatmul.mubr.msk.f32.vlgmr.msra.gmra.mrb[12].mxu1 %vm239_vm1, %v230_v13 }
  0xf0   : > { %v747_v24 = vpop.f32.mrb[6].mxu0  ;;  %v820_v25 = vpop.f32.mrb[6].mxu1  ;;  %1702 = vmatprep.mubr.msk.f32.mxu0 %vm239_vm1, %v229_v10  ;;  %1707 = vmatprep.mubr.msk.f32.mxu1 %vm239_vm1, %v229_v10 }
  0xf1   : > { %v1664_v26 = vpop.f32.mrb[7].mxu0  ;;  %v1669_v27 = vpop.f32.mrb[7].mxu1  ;;  %1700 = vmatprep.subr.mxu0 %v747_v24  ;;  %1705 = vmatprep.subr.mxu1 %v820_v25 }
  0xf2   : > { %1701 = vmatpush3.msra.mxu0 %v747_v24  ;;  %1706 = vmatpush3.msra.mxu1 %v820_v25 }
  0xf3   : > { %1703 = vmatmul.mubr.msk.f32.vlgmr.msra.gmra.mrb[14].mxu0 %vm239_vm1, %v230_v13  ;;  %1708 = vmatmul.mubr.msk.f32.vlgmr.msra.gmra.mrb[14].mxu1 %vm239_vm1, %v230_v13 }
 0x1ba   : > { %v1674_v41 = vpop.f32.mrb[8].mxu0  ;;  %v1679_v42 = vpop.f32.mrb[8].mxu1 }
 0x1bb   : > { %v1447_v46 = vmax.f32 %v1674_v41, %v1431_v28  ;;  %v1449_v47 = vmax.f32 %v1679_v42, %v1433_v29  ;;  %v896_v48 = vpop.f32.mrb[9].mxu0  ;;  %v971_v49 = vpop.f32.mrb[9].mxu1 }
 0x1bc   : > { %v1446_v50 = vmax.f32 %v896_v48, %v1430_v30  ;;  %v1448_v51 = vmax.f32 %v971_v49, %v1432_v31 }
 0x1bd   : > { %1464 = vst.msk [vmem:[%s1817_s8 + $0x8] sm:$0xff] %vm1462_vm2, %v1447_v46  ;;  %1466 = vst.msk [vmem:[%s1817_s8 + $0x18] sm:$0xff] %vm1462_vm2, %v1449_v47 }
 0x1be   : > { %v1684_v52 = vpop.f32.mrb[10].mxu0  ;;  %v1689_v53 = vpop.f32.mrb[10].mxu1  ;;  %1463 = vst.msk [vmem:[%s1817_s8] sm:$0xff] %vm1462_vm2, %v1446_v50  ;;  %1465 = vst.msk [vmem:[%s1817_s8 + $0x10] sm:$0xff] %vm1462_vm2, %v1448_v51 }
 0x1bf   : > { %v1451_v54 = vmax.f32 %v1684_v52, %v1435_v32  ;;  %v1453_v55 = vmax.f32 %v1689_v53, %v1437_v33  ;;  %v1046_v56 = vpop.f32.mrb[11].mxu0  ;;  %v1121_v57 = vpop.f32.mrb[11].mxu1 }
 0x1c0   : > { %v1450_v58 = vmax.f32 %v1046_v56, %v1434_v34  ;;  %v1452_v59 = vmax.f32 %v1121_v57, %v1436_v35 }
 0x1c1   : > { %1468 = vst.msk [vmem:[%s1817_s8 + $0x28] sm:$0xff] %vm1462_vm2, %v1451_v54  ;;  %1470 = vst.msk [vmem:[%s1817_s8 + $0x38] sm:$0xff] %vm1462_vm2, %v1453_v55 }
 0x1c2   : > { %v1694_v60 = vpop.f32.mrb[12].mxu0  ;;  %v1699_v61 = vpop.f32.mrb[12].mxu1  ;;  %1467 = vst.msk [vmem:[%s1817_s8 + $0x20] sm:$0xff] %vm1462_vm2, %v1450_v58  ;;  %1469 = vst.msk [vmem:[%s1817_s8 + $0x30] sm:$0xff] %vm1462_vm2, %v1452_v59 }
 0x1c3   : > { %v1455_v62 = vmax.f32 %v1694_v60, %v1439_v36  ;;  %v1457_v63 = vmax.f32 %v1699_v61, %v1441_v37  ;;  %v1196_v0 = vpop.f32.mrb[13].mxu0  ;;  %v1271_v1 = vpop.f32.mrb[13].mxu1 }
 0x1c4   : > { %v1454_v2 = vmax.f32 %v1196_v0, %v1438_v38  ;;  %v1456_v3 = vmax.f32 %v1271_v1, %v1440_v39 }
 0x1c5   : > { %1472 = vst.msk [vmem:[%s1817_s8 + $0x48] sm:$0xff] %vm1462_vm2, %v1455_v62  ;;  %1474 = vst.msk [vmem:[%s1817_s8 + $0x58] sm:$0xff] %vm1462_vm2, %v1457_v63 }
 0x1c6   : > { %v1704_v4 = vpop.f32.mrb[14].mxu0  ;;  %v1709_v5 = vpop.f32.mrb[14].mxu1  ;;  %1471 = vst.msk [vmem:[%s1817_s8 + $0x40] sm:$0xff] %vm1462_vm2, %v1454_v2  ;;  %1473 = vst.msk [vmem:[%s1817_s8 + $0x50] sm:$0xff] %vm1462_vm2, %v1456_v3 }
 0x1c7   : > { %v1459_v6 = vmax.f32 %v1704_v4, %v1443_v40  ;;  %v1461_v7 = vmax.f32 %v1709_v5, %v1445_v43  ;;  %v1346_v8 = vpop.f32.mrb[15].mxu0  ;;  %v1421_v9 = vpop.f32.mrb[15].mxu1 }
 0x1c8   : > { %v1458_v10 = vmax.f32 %v1346_v8, %v1442_v44  ;;  %v1460_v11 = vmax.f32 %v1421_v9, %v1444_v45 }
 0x1c9   : > { %1476 = vst.msk [vmem:[%s1817_s8 + $0x68] sm:$0xff] %vm1462_vm2, %v1459_v6  ;;  %1478 = vst.msk [vmem:[%s1817_s8 + $0x78] sm:$0xff] %vm1462_vm2, %v1461_v7 }
 0x1ca   : > { %1475 = vst.msk [vmem:[%s1817_s8 + $0x60] sm:$0xff] %vm1462_vm2, %v1458_v10  ;;  %1477 = vst.msk [vmem:[%s1817_s8 + $0x70] sm:$0xff] %vm1462_vm2, %v1460_v11 }
 0x1cb PF: > { %s14_s15 = sadd.s32 1, %s1726_s15  }
 0x1cc   : > { %p11_p4 = scmp.ge.s32.totalorder %s14_s15, 4  }
 0x1ce   :  { %13 = sbr.rel (!%p11_p4) target bundleno = 1 (0x1), region = 69 }

// kernel: msc_forward.11
= control target key start
LH: loop header
LB: loop body
LE: loop exit
PB: predicated region body
PF: predicated region fallthrough
CT: control target
= control target key end

     0   :  { %s1077_s12 = smov 0   ;;  %s1137_s0 = inlined_call_operand.vmem [shape: f32[12,16], index: 0, kind: input, shape index: {}]   ;;  %s1138_s1 = inlined_call_operand.vmem [shape: f32[16,12], index: 1, kind: input, shape index: {}]   ;;  %s1139_s2 = inlined_call_operand.vmem [shape: f32[8,16,16], index: 2, kind: input, shape index: {}]   ;;  %s1140_s3 = inlined_call_operand.vmem [shape: f32[8,12,12], index: 3, kind: output, shape index: {}]  }
   0x1 LB: > { %s890_s13 = sadd.s32 4294967295, %s1055_s12   ;;  %p894_p0 = scmp.ge.s32.totalorder %s1055_s12, 1  ;;  %s1055_s12 = sphi %s1077_s12, %s13_s12  }
   0x2   : > { %p139_p1 = scmp.lt.s32.totalorder %s1055_s12, 3 }
   0x4   : > { %p140_p2 = pnand %p894_p0, %p139_p1 }
   0x5   : > { %v179_v0 = vld [vmem:[%s1138_s1] sm:$0xff] (!%p140_p2)  ;;  %v180_v1 = vld [vmem:[%s1138_s1 + $0x8] sm:$0xff] (!%p140_p2)  ;;  %s895_s18 = sshll.u32 (!%p140_p2), %s890_s13, 2  ;;  %vm191_vm0 = vcmask (!%p140_p2), 130048   ;;  %vm824_vm1 = vcmask (!%p140_p2), 93184   ;;  %vm822_vm2 = vcmask (!%p140_p2), 97280  }
   0x6   : > { %143 = sbr.rel (%p140_p2) target bundleno = 456 (0x1c8), region = 32  ;;  %v1009_v2 = vpack.c.bf16 (!%p140_p2), %v180_v1, %v179_v0  ;;  %p166_p3 = scmp.lt.s32.totalorder (!%p140_p2), %s895_s18, 7  ;;  %v181_v11 = vld [vmem:[%s1137_s0] sm:$0xff] (!%p140_p2)  ;;  %v182_v22 = vld [vmem:[%s1137_s0 + $0x8] sm:$0xf] (!%p140_p2) }
   0x8   : > { %1010 = vmatprep.subr.bf16.mxu0 (!%p140_p2), %v1009_v2  ;;  %1014 = vmatprep.subr.bf16.mxu1 (!%p140_p2), %v1009_v2 }
   0x9   : > { %1012 = vmatpush3.bf16.msra.mxu0 (!%p140_p2), %v1009_v2  ;;  %1016 = vmatpush3.bf16.msra.mxu1 (!%p140_p2), %v1009_v2 }
   0xa   : > { %1018 = vmatprep.subr.bf16.mxu0 (!%p140_p2), %v1009_v2  ;;  %1022 = vmatprep.subr.bf16.mxu1 (!%p140_p2), %v1009_v2 }
   0xd   : > { %s1142_s18 = smov (!%p166_p3, %s895_s18), 7 }
   0xe   : > { %s919_s19 = sshll.u32 %s1142_s18, 4 }
   0xf   : > { %s170_s22 = scalar_lea.vmem %s1139_s2, %s919_s19  ;;  %s177_s29 = scalar_lea.vmem %s1140_s3, %s919_s19 }
  0x10   : > { %v183_v3 = vld [vmem:[%s170_s22] sm:$0xff]  ;;  %v185_v4 = vld [vmem:[%s170_s22 + $0x10] sm:$0xff]  ;;  %v184_v5 = vld [vmem:[%s170_s22 + $0x8] sm:$0xff] }
  0x11   : > { %957 = vmatprep.mubr.msk.f32.mxu0 %vm191_vm0, %v183_v3  ;;  %964 = vmatprep.mubr.msk.f32.mxu1 %vm191_vm0, %v185_v4  ;;  %v186_v6 = vld [vmem:[%s170_s22 + $0x18] sm:$0xff]  ;;  %v187_v7 = vld [vmem:[%s170_s22 + $0x20] sm:$0xff]  ;;  %v189_v8 = vld [vmem:[%s170_s22 + $0x30] sm:$0xff] }
  0x12   : > { %958 = vmatmul.mubr.msk.f32.vlgmr.msra.gmra.mrb[0].mxu0 %vm191_vm0, %v184_v5  ;;  %965 = vmatmul.mubr.msk.f32.vlgmr.msra.gmra.mrb[0].mxu1 %vm191_vm0, %v186_v6  ;;  %v188_v9 = vld [vmem:[%s170_s22 + $0x28] sm:$0xff]  ;;  %v190_v10 = vld [vmem:[%s170_s22 + $0x38] sm:$0xff] }
  0x13   : > { %1020 = vmatpush3.bf16.msra.mxu0 %v1009_v2  ;;  %1024 = vmatpush3.bf16.msra.mxu1 %v1009_v2 }
  0x14   : > { %971 = vmatprep.mubr.msk.f32.mxu0 %vm191_vm0, %v187_v7  ;;  %978 = vmatprep.mubr.msk.f32.mxu1 %vm191_vm0, %v189_v8 }
  0x16   : > { %972 = vmatmul.mubr.msk.f32.vlgmr.msra.gmra.mrb[2].mxu0 %vm191_vm0, %v188_v9  ;;  %979 = vmatmul.mubr.msk.f32.vlgmr.msra.gmra.mrb[2].mxu1 %vm191_vm0, %v190_v10 }
  0x17   : > { %985 = vmatprep.mubr.msk.f32.mxu0 %vm191_vm0, %v181_v11  ;;  %992 = vmatprep.mubr.msk.f32.mxu1 %vm191_vm0, %v181_v11 }
  0xe5   : > { %v959_v12 = vpop.f32.mrb[0].mxu0  ;;  %v966_v13 = vpop.f32.mrb[0].mxu1 }
  0xe6   : > { %v264_v14 = vpop.f32.mrb[1].mxu0  ;;  %v345_v15 = vpop.f32.mrb[1].mxu1 }
  0xe7   : > { %v1025_v16 = vpack.c.bf16 %v959_v12, %v264_v14  ;;  %v1029_v17 = vpack.c.bf16 %v966_v13, %v345_v15 }
  0xe9   : > { %v973_v18 = vpop.f32.mrb[2].mxu0  ;;  %v980_v19 = vpop.f32.mrb[2].mxu1  ;;  %1026 = vmatprep.subr.bf16.mxu0 %v1025_v16  ;;  %1030 = vmatprep.subr.bf16.mxu1 %v1029_v17 }
  0xea   : > { %v426_v20 = vpop.f32.mrb[3].mxu0  ;;  %v507_v21 = vpop.f32.mrb[3].mxu1  ;;  %1028 = vmatpush3.bf16.msra.mxu0 %v1025_v16  ;;  %1032 = vmatpush3.bf16.msra.mxu1 %v1029_v17 }
  0xeb   : > { %v1033_v23 = vpack.c.bf16 %v973_v18, %v426_v20  ;;  %v1037_v24 = vpack.c.bf16 %v980_v19, %v507_v21 }
  0xed   : > { %986 = vmatmul.mubr.msk.f32.vlgmr.msra.gmra.mrb[4].mxu0 %vm191_vm0, %v182_v22  ;;  %1034 = vmatprep.subr.bf16.mxu0 %v1033_v23 }
  0xee   : > { %1038 = vmatprep.subr.bf16.mxu1 %v1037_v24  ;;  %993 = vmatmul.mubr.msk.f32.vlgmr.msra.gmra.mrb[4].mxu1 %vm191_vm0, %v182_v22 }
  0xef   : > { %1036 = vmatpush3.bf16.msra.mxu0 %v1033_v23  ;;  %1040 = vmatpush3.bf16.msra.mxu1 %v1037_v24 }
  0xf0   : > { %999 = vmatprep.mubr.msk.f32.mxu0 %vm191_vm0, %v181_v11  ;;  %1006 = vmatprep.mubr.msk.f32.mxu1 %vm191_vm0, %v181_v11 }
  0xf2   : > { %1000 = vmatmul.mubr.msk.f32.vlgmr.msra.gmra.mrb[6].mxu0 %vm191_vm0, %v182_v22  ;;  %1007 = vmatmul.mubr.msk.f32.vlgmr.msra.gmra.mrb[6].mxu1 %vm191_vm0, %v182_v22 }
 0x1c0   : > { %v987_v25 = vpop.f32.mrb[4].mxu0 }
 0x1c1   : > { %825 = vst.msk [vmem:[%s177_s29 + $0x8] sm:$0xf] %vm824_vm1, %v987_v25  ;;  %v588_v26 = vpop.f32.mrb[5].mxu0  ;;  %v994_v27 = vpop.f32.mrb[4].mxu1 }
 0x1c2   : > { %823 = vst.msk [vmem:[%s177_s29] sm:$0xff] %vm822_vm2, %v588_v26  ;;  %v663_v28 = vpop.f32.mrb[5].mxu1 }
 0x1c3   : > { %827 = vst.msk [vmem:[%s177_s29 + $0x18] sm:$0xf] %vm824_vm1, %v994_v27 }
 0x1c4   : > { %826 = vst.msk [vmem:[%s177_s29 + $0x10] sm:$0xff] %vm822_vm2, %v663_v28 }
 0x1c5   : > { %v1001_v29 = vpop.f32.mrb[6].mxu0  ;;  %v1008_v30 = vpop.f32.mrb[6].mxu1 }
 0x1c6   : > { %829 = vst.msk [vmem:[%s177_s29 + $0x28] sm:$0xf] %vm824_vm1, %v1001_v29  ;;  %v738_v31 = vpop.f32.mrb[7].mxu0  ;;  %v813_v32 = vpop.f32.mrb[7].mxu1  ;;  %831 = vst.msk [vmem:[%s177_s29 + $0x38] sm:$0xf] %vm824_vm1, %v1008_v30 }
 0x1c7   : > { %828 = vst.msk [vmem:[%s177_s29 + $0x20] sm:$0xff] %vm822_vm2, %v738_v31  ;;  %830 = vst.msk [vmem:[%s177_s29 + $0x30] sm:$0xff] %vm822_vm2, %v813_v32 }
 0x1c8 PF: > { %s13_s12 = sadd.s32 1, %s1055_s12  }
 0x1c9   : > { %p10_p4 = scmp.ge.s32.totalorder %s13_s12, 4  }
 0x1cb   :  { %12 = sbr.rel (!%p10_p4) target bundleno = 1 (0x1), region = 62 }

// kernel: msc_forward.12
= control target key start
LH: loop header
LB: loop body
LE: loop exit
PB: predicated region body
PF: predicated region fallthrough
CT: control target
= control target key end

     0   :  { %s480_s12 = smov 0   ;;  %s482_s13 = smov 0   ;;  %s519_s0 = inlined_call_operand.vmem [shape: f32[8,4], index: 0, kind: input, shape index: {}]   ;;  %s520_s1 = inlined_call_operand.vmem [shape: f32[8,1], index: 1, kind: input, shape index: {}]   ;;  %s521_s2 = inlined_call_operand.vmem [shape: f32[2,4,144], index: 2, kind: input, shape index: {}]   ;;  %s522_s3 = inlined_call_operand.vmem [shape: f32[2,8,144], index: 3, kind: output, shape index: {}]  }
   0x1   :  { %s484_s14 = smov 0  }
   0x2 LB: > { %s25_s15 = sadd.s32 1, %s452_s13  ;;  %p394_p0 = scmp.ge.s32.totalorder %s456_s14, 1  ;;  %s456_s14 = sphi %s484_s14, %s13_s14   ;;  %s452_s13 = sphi %s482_s13, %s524_s13   ;;  %s448_s12 = sphi %s480_s12, %s523_s12  }
   0x3   : > { %p27_p1 = scmp.ge.s32.totalorder %s25_s15, 2  ;;  %p158_p2 = scmp.lt.s32.totalorder %s456_s14, 3 }
   0x5   : > { %s526_s15 = smov (%p27_p1, %s25_s15), 0  ;;  %p159_p3 = pnand %p394_p0, %p158_p2 }
   0x6   : > { %p191_p4 = scmp.lt.s32.totalorder (!%p159_p3), %s448_s12, 1  ;;  %v458_v0 = vmov (!%p159_p3), 0.0   ;;  %v459_v1 = vmov (!%p159_p3), 0   ;;  %v212_v2 = vld [vmem:[%s520_s1] sm:$0xff] (!%p159_p3)  ;;  %vm224_vm0 = vcmask (!%p159_p3), 1043456   ;;  %vm220_vm1 = vcmask (!%p159_p3), 31744  }
   0x7   : > { %162 = sbr.rel (%p159_p3) target bundleno = 238 (0xee), region = 32  ;;  %293 = vmatprep.mubr.f32.mxu0 (!%p159_p3), %v458_v0  ;;  %432 = vset.pattern.permute.xlu0 (!%p159_p3), %v459_v1  ;;  %v210_v5 = vld [vmem:[%s519_s0] sm:$0xff] (!%p159_p3)  ;;  %vm301_vm2 = vcmask (!%p159_p3), 130048  }
   0x8   : > { %215 = vperm.xlu0 (!%p159_p3), %432, %v212_v2  }
   0xe   : > { %s528_s12 = smov (!%p191_p4, %s448_s12), 1 }
   0xf   : > { %s404_s18 = sshll.u32 %s528_s12, 3  ;;  %s405_s24 = sshll.u32 %s528_s12, 4 }
  0x10   : > { %s198_s21 = scalar_lea.vmem %s521_s2, %s404_s18  ;;  %s208_s27 = scalar_lea.vmem %s522_s3, %s405_s24 }
  0x11   : > { %v211_v3 = vld [vmem:[%s198_s21] sm:$0xff] }
  0x12   : > { %v219_v4 = vcombine.high %v211_v3, %v211_v3 }
  0x14   : > { %399 = vmatprep.subr.msk.mxu0 %vm224_vm0, %v219_v4 }
  0x15   : > { %400 = vmatpush1.msk.msra.mxu0 %vm224_vm0, %v211_v3 }
  0x16   : > { %401 = vmatmul.mubr.msk.f32.vlgmr.msra.gmra.mrb[0].mxu0 %vm220_vm1, %v210_v5 }
  0x87   : > { %v216_v6 = vpop.permute.xlu0 %215 }
  0xe9   : > { %v295_v7 = vpop.f32.mrb[0].mxu0 }
  0xea   : > { %v296_v8 = vadd.f32 %v295_v7, %v216_v6  ;;  %v297_v9 = vpop.f32.mrb[1].mxu0 }
  0xeb   : > { %v298_v10 = vadd.f32 %v297_v9, %v216_v6 }
  0xec   : > { %300 = vst [vmem:[%s208_s27] sm:$0xff] %v296_v8 }
  0xed   : > { %302 = vst.msk [vmem:[%s208_s27 + $0x8] sm:$0xff] %vm301_vm2, %v298_v10 }
  0xee PF: > { %s13_s14 = sadd.s32 1, %s456_s14   ;;  %s523_s12 = smov %s452_s13 }
  0xef   : > { %p10_p5 = scmp.ge.s32.totalorder %s13_s14, 4   ;;  %s524_s13 = smov %s526_s15 }
  0xf1   :  { %12 = sbr.rel (!%p10_p5) target bundleno = 2 (0x2), region = 62 }

// kernel: msc_forward.13
= control target key start
LH: loop header
LB: loop body
LE: loop exit
PB: predicated region body
PF: predicated region fallthrough
CT: control target
= control target key end

     0   :  { %s2035_s15 = smov 0   ;;  %s2224_s0 = inlined_call_operand.vmem [shape: f32[16,12], index: 0, kind: input, shape index: {}]   ;;  %s2225_s1 = inlined_call_operand.vmem [shape: f32[12,16], index: 1, kind: input, shape index: {}]   ;;  %s2226_s2 = inlined_call_operand.vmem [shape: f32[16,12,12], index: 2, kind: input, shape index: {}]   ;;  %s2227_s3 = inlined_call_operand.vmem [shape: f32[16,16,16], index: 3, kind: input, shape index: {}, may-alias: {3,4}]   ;;  %s2228_s4 = inlined_call_operand.vmem [shape: f32[16,16,16], index: 4, kind: output, shape index: {}, may-alias: {3,4}]  }
   0x1 LB: > { %s1653_s16 = sadd.s32 4294967295, %s2007_s15   ;;  %p1657_p0 = scmp.ge.s32.totalorder %s2007_s15, 1  ;;  %s2007_s15 = sphi %s2035_s15, %s14_s15  }
   0x2   : > { %p176_p1 = scmp.lt.s32.totalorder %s2007_s15, 3 }
   0x4   : > { %p177_p2 = pnand %p1657_p0, %p176_p1 }
   0x5   : > { %v231_v0 = vld [vmem:[%s2225_s1] sm:$0xff] (!%p177_p2)  ;;  %v232_v1 = vld [vmem:[%s2225_s1 + $0x8] sm:$0xf] (!%p177_p2)  ;;  %vm258_vm0 = vcmask (!%p177_p2), 1043456   ;;  %s1658_s21 = sshll.u32 (!%p177_p2), %s1653_s16, 3  ;;  %vm2009_vm1 = vmmov (!%p177_p2), 1  }
   0x6   : > { %180 = sbr.rel (%p177_p2) target bundleno = 466 (0x1d2), region = 36  ;;  %v1896_v2 = vpack.c.bf16 (!%p177_p2), %v232_v1, %v231_v0  ;;  %vm2049_vm2 = vmpackc.low (!%p177_p2), %vm258_vm0, %vm2009_vm1  ;;  %p211_p3 = scmp.lt.s32.totalorder (!%p177_p2), %s1658_s21, 15  ;;  %vm251_vm3 = vcmask (!%p177_p2), 97280   ;;  %v233_v20 = vld [vmem:[%s2224_s0] sm:$0xff] (!%p177_p2)  ;;  %v234_v31 = vld [vmem:[%s2224_s0 + $0x8] sm:$0xff] (!%p177_p2)  ;;  %vm1566_vm4 = vcmask (!%p177_p2), 130048  }
   0x8   : > { %1898 = vmatprep.subr.msk.bf16.mxu0 (!%p177_p2), %vm2049_vm2, %v1896_v2  ;;  %1904 = vmatprep.subr.msk.bf16.mxu1 (!%p177_p2), %vm2049_vm2, %v1896_v2 }
   0x9   : > { %1901 = vmatpush3.bf16.msk.msra.mxu0 (!%p177_p2), %vm2049_vm2, %v1896_v2  ;;  %1907 = vmatpush3.bf16.msk.msra.mxu1 (!%p177_p2), %vm2049_vm2, %v1896_v2 }
   0xa   : > { %1910 = vmatprep.subr.msk.bf16.mxu0 (!%p177_p2), %vm2049_vm2, %v1896_v2  ;;  %1916 = vmatprep.subr.msk.bf16.mxu1 (!%p177_p2), %vm2049_vm2, %v1896_v2 }
   0xd   : > { %s2232_s21 = smov (!%p211_p3, %s1658_s21), 15 }
   0xe   : > { %s2061_s22 = sshll.u32 %s2232_s21, 4 }
   0xf   : > { %s2071_s25 = scalar_lea.vmem %s2226_s2, %s2061_s22  ;;  %s222_s6 = scalar_lea.vmem %s2227_s3, %s2061_s22 }
  0x10   : > { %v235_v4 = vld [vmem:[%s2071_s25] sm:$0xff]  ;;  %v237_v5 = vld [vmem:[%s2071_s25 + $0x10] sm:$0xff]  ;;  %v236_v6 = vld [vmem:[%s2071_s25 + $0x8] sm:$0xf]  ;;  %s2187_s9 = scalar_lea.vmem %s2228_s4, %s2061_s22 }
  0x11   : > { %1788 = vmatprep.mubr.msk.f32.mxu0 %vm251_vm3, %v235_v4  ;;  %1795 = vmatprep.mubr.msk.f32.mxu1 %vm251_vm3, %v237_v5  ;;  %v238_v7 = vld [vmem:[%s2071_s25 + $0x18] sm:$0xf]  ;;  %v239_v8 = vld [vmem:[%s2071_s25 + $0x20] sm:$0xff]  ;;  %v241_v9 = vld [vmem:[%s2071_s25 + $0x30] sm:$0xff] }
  0x12   : > { %1789 = vmatmul.mubr.msk.f32.vlgmr.msra.gmra.mrb[0].mxu0 %vm251_vm3, %v236_v6  ;;  %1796 = vmatmul.mubr.msk.f32.vlgmr.msra.gmra.mrb[0].mxu1 %vm251_vm3, %v238_v7  ;;  %v240_v10 = vld [vmem:[%s2071_s25 + $0x28] sm:$0xf]  ;;  %v242_v11 = vld [vmem:[%s2071_s25 + $0x38] sm:$0xf]  ;;  %v243_v12 = vld [vmem:[%s2071_s25 + $0x40] sm:$0xff] }
  0x13   : > { %1913 = vmatpush3.bf16.msk.msra.mxu0 %vm2049_vm2, %v1896_v2  ;;  %1919 = vmatpush3.bf16.msk.msra.mxu1 %vm2049_vm2, %v1896_v2  ;;  %v245_v13 = vld [vmem:[%s2071_s25 + $0x50] sm:$0xff]  ;;  %v244_v14 = vld [vmem:[%s2071_s25 + $0x48] sm:$0xf]  ;;  %v246_v15 = vld [vmem:[%s2071_s25 + $0x58] sm:$0xf] }
  0x14   : > { %1802 = vmatprep.mubr.msk.f32.mxu0 %vm251_vm3, %v239_v8  ;;  %1809 = vmatprep.mubr.msk.f32.mxu1 %vm251_vm3, %v241_v9  ;;  %v247_v16 = vld [vmem:[%s2071_s25 + $0x60] sm:$0xff]  ;;  %v249_v17 = vld [vmem:[%s2071_s25 + $0x70] sm:$0xff]  ;;  %v248_v18 = vld [vmem:[%s2071_s25 + $0x68] sm:$0xf] }
  0x15   : > { %1922 = vmatprep.subr.msk.bf16.mxu0 %vm2049_vm2, %v1896_v2  ;;  %1928 = vmatprep.subr.msk.bf16.mxu1 %vm2049_vm2, %v1896_v2  ;;  %v250_v19 = vld [vmem:[%s2071_s25 + $0x78] sm:$0xf]  ;;  %v1535_v46 = vld [vmem:[%s222_s6 + $0x8] sm:$0xff]  ;;  %v1534_v48 = vld [vmem:[%s222_s6] sm:$0xff] }
  0x16   : > { %1803 = vmatmul.mubr.msk.f32.vlgmr.msra.gmra.mrb[2].mxu0 %vm251_vm3, %v240_v10  ;;  %1810 = vmatmul.mubr.msk.f32.vlgmr.msra.gmra.mrb[2].mxu1 %vm251_vm3, %v242_v11  ;;  %v1537_v47 = vld [vmem:[%s222_s6 + $0x18] sm:$0xff]  ;;  %v1536_v49 = vld [vmem:[%s222_s6 + $0x10] sm:$0xff]  ;;  %v1539_v50 = vld [vmem:[%s222_s6 + $0x28] sm:$0xff] }
  0x17   : > { %1925 = vmatpush3.bf16.msk.msra.mxu0 %vm2049_vm2, %v1896_v2  ;;  %1931 = vmatpush3.bf16.msk.msra.mxu1 %vm2049_vm2, %v1896_v2  ;;  %v1541_v51 = vld [vmem:[%s222_s6 + $0x38] sm:$0xff]  ;;  %v1538_v52 = vld [vmem:[%s222_s6 + $0x20] sm:$0xff]  ;;  %v1540_v53 = vld [vmem:[%s222_s6 + $0x30] sm:$0xff] }
  0x18   : > { %1816 = vmatprep.mubr.msk.f32.mxu0 %vm251_vm3, %v243_v12  ;;  %1823 = vmatprep.mubr.msk.f32.mxu1 %vm251_vm3, %v245_v13  ;;  %v1543_v54 = vld [vmem:[%s222_s6 + $0x48] sm:$0xff]  ;;  %v1545_v55 = vld [vmem:[%s222_s6 + $0x58] sm:$0xff]  ;;  %v1542_v56 = vld [vmem:[%s222_s6 + $0x40] sm:$0xff] }
  0x19   : > { %1934 = vmatprep.subr.msk.bf16.mxu0 %vm2049_vm2, %v1896_v2  ;;  %1940 = vmatprep.subr.msk.bf16.mxu1 %vm2049_vm2, %v1896_v2  ;;  %v1544_v57 = vld [vmem:[%s222_s6 + $0x50] sm:$0xff]  ;;  %v1547_v58 = vld [vmem:[%s222_s6 + $0x68] sm:$0xff]  ;;  %v1549_v61 = vld [vmem:[%s222_s6 + $0x78] sm:$0xff] }
  0x1a   : > { %1817 = vmatmul.mubr.msk.f32.vlgmr.msra.gmra.mrb[4].mxu0 %vm251_vm3, %v244_v14  ;;  %1824 = vmatmul.mubr.msk.f32.vlgmr.msra.gmra.mrb[4].mxu1 %vm251_vm3, %v246_v15  ;;  %v1546_v62 = vld [vmem:[%s222_s6 + $0x60] sm:$0xff]  ;;  %v1548_v63 = vld [vmem:[%s222_s6 + $0x70] sm:$0xff] }
  0x1b   : > { %1937 = vmatpush3.bf16.msk.msra.mxu0 %vm2049_vm2, %v1896_v2  ;;  %1943 = vmatpush3.bf16.msk.msra.mxu1 %vm2049_vm2, %v1896_v2 }
  0x1c   : > { %1830 = vmatprep.mubr.msk.f32.mxu0 %vm251_vm3, %v247_v16  ;;  %1837 = vmatprep.mubr.msk.f32.mxu1 %vm251_vm3, %v249_v17 }
  0x1e   : > { %1831 = vmatmul.mubr.msk.f32.vlgmr.msra.gmra.mrb[6].mxu0 %vm251_vm3, %v248_v18  ;;  %1838 = vmatmul.mubr.msk.f32.vlgmr.msra.gmra.mrb[6].mxu1 %vm251_vm3, %v250_v19 }
  0x1f   : > { %1844 = vmatprep.mubr.msk.f32.mxu0 %vm251_vm3, %v233_v20  ;;  %1851 = vmatprep.mubr.msk.f32.mxu1 %vm251_vm3, %v233_v20 }
  0xe5   : > { %v1790_v21 = vpop.f32.mrb[0].mxu0  ;;  %v1797_v22 = vpop.f32.mrb[0].mxu1 }
  0xe6   : > { %v328_v23 = vpop.f32.mrb[1].mxu0  ;;  %v409_v24 = vpop.f32.mrb[1].mxu1 }
  0xe7   : > { %v1944_v25 = vpack.c.bf16 %v1790_v21, %v328_v23  ;;  %v1950_v26 = vpack.c.bf16 %v1797_v22, %v409_v24 }
  0xe9   : > { %v1804_v27 = vpop.f32.mrb[2].mxu0  ;;  %v1811_v28 = vpop.f32.mrb[2].mxu1  ;;  %1946 = vmatprep.subr.msk.bf16.mxu0 %vm2049_vm2, %v1944_v25  ;;  %1952 = vmatprep.subr.msk.bf16.mxu1 %vm2049_vm2, %v1950_v26 }
  0xea   : > { %v490_v29 = vpop.f32.mrb[3].mxu0  ;;  %v571_v30 = vpop.f32.mrb[3].mxu1  ;;  %1949 = vmatpush3.bf16.msk.msra.mxu0 %vm2049_vm2, %v1944_v25  ;;  %1955 = vmatpush3.bf16.msk.msra.mxu1 %vm2049_vm2, %v1950_v26 }
  0xeb   : > { %v1956_v32 = vpack.c.bf16 %v1804_v27, %v490_v29  ;;  %v1962_v33 = vpack.c.bf16 %v1811_v28, %v571_v30 }
  0xed   : > { %v1818_v34 = vpop.f32.mrb[4].mxu0  ;;  %v1825_v35 = vpop.f32.mrb[4].mxu1  ;;  %1845 = vmatmul.mubr.msk.f32.vlgmr.msra.gmra.mrb[8].mxu0 %vm251_vm3, %v234_v31  ;;  %1852 = vmatmul.mubr.msk.f32.vlgmr.msra.gmra.mrb[8].mxu1 %vm251_vm3, %v234_v31 }
  0xee   : > { %1958 = vmatprep.subr.msk.bf16.mxu0 %vm2049_vm2, %v1956_v32  ;;  %1964 = vmatprep.subr.msk.bf16.mxu1 %vm2049_vm2, %v1962_v33  ;;  %v652_v36 = vpop.f32.mrb[5].mxu0  ;;  %v733_v37 = vpop.f32.mrb[5].mxu1 }
  0xef   : > { %v1968_v38 = vpack.c.bf16 %v1818_v34, %v652_v36  ;;  %v1974_v39 = vpack.c.bf16 %v1825_v35, %v733_v37  ;;  %1961 = vmatpush3.bf16.msk.msra.mxu0 %vm2049_vm2, %v1956_v32  ;;  %1967 = vmatpush3.bf16.msk.msra.mxu1 %vm2049_vm2, %v1962_v33 }
  0xf0   : > { %1858 = vmatprep.mubr.msk.f32.mxu0 %vm251_vm3, %v233_v20  ;;  %1865 = vmatprep.mubr.msk.f32.mxu1 %vm251_vm3, %v233_v20 }
  0xf1   : > { %v1832_v40 = vpop.f32.mrb[6].mxu0  ;;  %v1839_v41 = vpop.f32.mrb[6].mxu1  ;;  %1970 = vmatprep.subr.msk.bf16.mxu0 %vm2049_vm2, %v1968_v38  ;;  %1976 = vmatprep.subr.msk.bf16.mxu1 %vm2049_vm2, %v1974_v39 }
  0xf2   : > { %1859 = vmatmul.mubr.msk.f32.vlgmr.msra.gmra.mrb[10].mxu0 %vm251_vm3, %v234_v31  ;;  %1866 = vmatmul.mubr.msk.f32.vlgmr.msra.gmra.mrb[10].mxu1 %vm251_vm3, %v234_v31  ;;  %v814_v42 = vpop.f32.mrb[7].mxu0  ;;  %v895_v43 = vpop.f32.mrb[7].mxu1 }
  0xf3   : > { %v1980_v44 = vpack.c.bf16 %v1832_v40, %v814_v42  ;;  %v1986_v45 = vpack.c.bf16 %v1839_v41, %v895_v43  ;;  %1973 = vmatpush3.bf16.msk.msra.mxu0 %vm2049_vm2, %v1968_v38  ;;  %1979 = vmatpush3.bf16.msk.msra.mxu1 %vm2049_vm2, %v1974_v39 }
  0xf4   : > { %1872 = vmatprep.mubr.msk.f32.mxu0 %vm251_vm3, %v233_v20  ;;  %1879 = vmatprep.mubr.msk.f32.mxu1 %vm251_vm3, %v233_v20 }
  0xf5   : > { %1982 = vmatprep.subr.msk.bf16.mxu0 %vm2049_vm2, %v1980_v44  ;;  %1988 = vmatprep.subr.msk.bf16.mxu1 %vm2049_vm2, %v1986_v45 }
  0xf6   : > { %1873 = vmatmul.mubr.msk.f32.vlgmr.msra.gmra.mrb[12].mxu0 %vm251_vm3, %v234_v31  ;;  %1880 = vmatmul.mubr.msk.f32.vlgmr.msra.gmra.mrb[12].mxu1 %vm251_vm3, %v234_v31 }
  0xf7   : > { %1985 = vmatpush3.bf16.msk.msra.mxu0 %vm2049_vm2, %v1980_v44  ;;  %1991 = vmatpush3.bf16.msk.msra.mxu1 %vm2049_vm2, %v1986_v45 }
  0xf8   : > { %1886 = vmatprep.mubr.msk.f32.mxu0 %vm251_vm3, %v233_v20  ;;  %1893 = vmatprep.mubr.msk.f32.mxu1 %vm251_vm3, %v233_v20 }
  0xfa   : > { %1887 = vmatmul.mubr.msk.f32.vlgmr.msra.gmra.mrb[14].mxu0 %vm251_vm3, %v234_v31  ;;  %1894 = vmatmul.mubr.msk.f32.vlgmr.msra.gmra.mrb[14].mxu1 %vm251_vm3, %v234_v31 }
 0x1c0   : > { %v1846_v59 = vpop.f32.mrb[8].mxu0  ;;  %v1853_v60 = vpop.f32.mrb[8].mxu1 }
 0x1c1   : > { %v1551_v0 = vmax.f32 %v1846_v59, %v1535_v46  ;;  %v1553_v1 = vmax.f32 %v1853_v60, %v1537_v47  ;;  %v979_v2 = vpop.f32.mrb[9].mxu0  ;;  %v1057_v3 = vpop.f32.mrb[9].mxu1 }
 0x1c2   : > { %v1550_v4 = vmax.f32 %v979_v2, %v1534_v48  ;;  %v1552_v5 = vmax.f32 %v1057_v3, %v1536_v49 }
 0x1c3   : > { %1568 = vst.msk [vmem:[%s2187_s9 + $0x8] sm:$0xff] %vm1566_vm4, %v1551_v0  ;;  %1570 = vst.msk [vmem:[%s2187_s9 + $0x18] sm:$0xff] %vm1566_vm4, %v1553_v1 }
 0x1c4   : > { %1567 = vst.msk [vmem:[%s2187_s9] sm:$0xff] %vm1566_vm4, %v1550_v4  ;;  %1569 = vst.msk [vmem:[%s2187_s9 + $0x10] sm:$0xff] %vm1566_vm4, %v1552_v5 }
 0x1c5   : > { %v1860_v6 = vpop.f32.mrb[10].mxu0  ;;  %v1867_v7 = vpop.f32.mrb[10].mxu1 }
 0x1c6   : > { %v1555_v8 = vmax.f32 %v1860_v6, %v1539_v50  ;;  %v1557_v9 = vmax.f32 %v1867_v7, %v1541_v51  ;;  %v1135_v10 = vpop.f32.mrb[11].mxu0  ;;  %v1213_v11 = vpop.f32.mrb[11].mxu1 }
 0x1c7   : > { %v1554_v12 = vmax.f32 %v1135_v10, %v1538_v52  ;;  %v1556_v13 = vmax.f32 %v1213_v11, %v1540_v53 }
 0x1c8   : > { %1572 = vst.msk [vmem:[%s2187_s9 + $0x28] sm:$0xff] %vm1566_vm4, %v1555_v8  ;;  %1574 = vst.msk [vmem:[%s2187_s9 + $0x38] sm:$0xff] %vm1566_vm4, %v1557_v9 }
 0x1c9   : > { %v1874_v14 = vpop.f32.mrb[12].mxu0  ;;  %v1881_v15 = vpop.f32.mrb[12].mxu1  ;;  %1571 = vst.msk [vmem:[%s2187_s9 + $0x20] sm:$0xff] %vm1566_vm4, %v1554_v12  ;;  %1573 = vst.msk [vmem:[%s2187_s9 + $0x30] sm:$0xff] %vm1566_vm4, %v1556_v13 }
 0x1ca   : > { %v1559_v16 = vmax.f32 %v1874_v14, %v1543_v54  ;;  %v1561_v17 = vmax.f32 %v1881_v15, %v1545_v55  ;;  %v1291_v18 = vpop.f32.mrb[13].mxu0  ;;  %v1369_v19 = vpop.f32.mrb[13].mxu1 }
 0x1cb   : > { %v1558_v20 = vmax.f32 %v1291_v18, %v1542_v56  ;;  %v1560_v21 = vmax.f32 %v1369_v19, %v1544_v57 }
 0x1cc   : > { %1576 = vst.msk [vmem:[%s2187_s9 + $0x48] sm:$0xff] %vm1566_vm4, %v1559_v16  ;;  %1578 = vst.msk [vmem:[%s2187_s9 + $0x58] sm:$0xff] %vm1566_vm4, %v1561_v17 }
 0x1cd   : > { %v1888_v22 = vpop.f32.mrb[14].mxu0  ;;  %v1895_v23 = vpop.f32.mrb[14].mxu1  ;;  %1575 = vst.msk [vmem:[%s2187_s9 + $0x40] sm:$0xff] %vm1566_vm4, %v1558_v20  ;;  %1577 = vst.msk [vmem:[%s2187_s9 + $0x50] sm:$0xff] %vm1566_vm4, %v1560_v21 }
 0x1ce   : > { %v1563_v24 = vmax.f32 %v1888_v22, %v1547_v58  ;;  %v1565_v25 = vmax.f32 %v1895_v23, %v1549_v61  ;;  %v1447_v26 = vpop.f32.mrb[15].mxu0  ;;  %v1525_v27 = vpop.f32.mrb[15].mxu1 }
 0x1cf   : > { %v1562_v28 = vmax.f32 %v1447_v26, %v1546_v62  ;;  %v1564_v29 = vmax.f32 %v1525_v27, %v1548_v63 }
 0x1d0   : > { %1580 = vst.msk [vmem:[%s2187_s9 + $0x68] sm:$0xff] %vm1566_vm4, %v1563_v24  ;;  %1582 = vst.msk [vmem:[%s2187_s9 + $0x78] sm:$0xff] %vm1566_vm4, %v1565_v25 }
 0x1d1   : > { %1579 = vst.msk [vmem:[%s2187_s9 + $0x60] sm:$0xff] %vm1566_vm4, %v1562_v28  ;;  %1581 = vst.msk [vmem:[%s2187_s9 + $0x70] sm:$0xff] %vm1566_vm4, %v1564_v29 }
 0x1d2 PF: > { %s14_s15 = sadd.s32 1, %s2007_s15  }
 0x1d3   : > { %p11_p4 = scmp.ge.s32.totalorder %s14_s15, 4  }
 0x1d5   :  { %13 = sbr.rel (!%p11_p4) target bundleno = 1 (0x1), region = 69 }

</bundles_post_ra>
